<compile_context>
chip_gen: v7x
topology: tpu7x:2x2x1
jax: 0.10.0
libtpu: 0.0.40
codegen_flags: <defaults>
</compile_context>

<pallas_src>
import functools

import jax
import jax.numpy as jnp
from jax.experimental import pallas as pl
from jax.experimental.pallas import tpu as pltpu

FEAT = 2048           # ResNet-152 final feature width (fixed by the classifier)
N_FEAT_BLOCKS = 2     # "parallel" feature blocks (v7x has 2 TensorCores/chip)
HW_TILE_CAP = 2048    # spatial rows per tile; keeps the f32 (T_HW, T_F)
                      # intermediate <= 8 MiB (safe for v7x's 64 MiB VMEM,
                      # plenty of headroom on v5e/v6e's 128 MiB)


def _pick_hw_tile(hw, cap=HW_TILE_CAP):
    """Largest tile <= cap that is a multiple of 128 and divides HW (or HW itself)."""
    if hw <= cap:
        return hw
    t = (cap // 128) * 128
    while t >= 128:
        if hw % t == 0:
            return t
        t -= 128
    return hw


def _covnet_kernel(x_ref, wproj_ref, wcls_ref, bcls_ref, out_ref,
                   sum_ref, max_ref, *, inv_hw):
    """Grid: (feature_block [parallel], slice N [arbitrary], HW tile [arbitrary])."""
    f = pl.program_id(0)
    n = pl.program_id(1)
    s = pl.program_id(2)
    last_n = pl.num_programs(1) - 1
    last_s = pl.num_programs(2) - 1

    # Fresh spatial-sum accumulator at the start of every slice.
    @pl.when(s == 0)
    def _():
        sum_ref[...] = jnp.zeros_like(sum_ref)

    # Fresh running max at the start of this feature block's pass over N.
    @pl.when(jnp.logical_and(n == 0, s == 0))
    def _():
        max_ref[...] = jnp.full_like(max_ref, -jnp.inf)

    # --- backbone proxy: 1x1 conv + ReLU --------------------------------
    # x tile is (C, T_HW) bf16 (native NCHW layout, HW lane-dense); contract
    # over C against the (C, T_F) bf16 weight -> (T_HW, T_F) f32 on the MXU.
    feat = jax.lax.dot_general(
        x_ref[...], wproj_ref[...],
        dimension_numbers=(((0,), (0,)), ((), ())),
        preferred_element_type=jnp.float32)              # (T_HW, T_F)
    feat = jnp.maximum(feat, 0.0)                        # ReLU

    # --- AdaptiveAvgPool2d(1): accumulate spatial sum (mean applied later) --
    sum_ref[...] += jnp.sum(feat, axis=0, keepdims=True)  # (1, T_F)

    # --- end of this slice: fold spatial mean into running max over slices --
    @pl.when(s == last_s)
    def _():
        pooled = sum_ref[...] * inv_hw                   # (1, T_F)
        max_ref[...] = jnp.maximum(max_ref[...], pooled)

    # --- last step of this feature block: partial Linear(2048, n_classes) ---
    @pl.when(jnp.logical_and(n == last_n, s == last_s))
    def _():
        partial = jax.lax.dot_general(
            max_ref[...], wcls_ref[...],
            dimension_numbers=(((1,), (1,)), ((), ())),
            preferred_element_type=jnp.float32)          # (1, n_classes)
        # Bias is added exactly once (feature block 0); partials are summed
        # on the host.
        partial = jnp.where(f == 0, partial + bcls_ref[...], partial)
        out_ref[...] = partial.astype(out_ref.dtype)


def covnet_forward(x, w_proj, w_cls, b_cls):
    """x: (1, N, C, H, W) f32. w_proj: (C, FEAT). w_cls: (n_classes, FEAT).
    b_cls: (1, n_classes). Returns (1, n_classes) f32 logits."""
    assert x.shape[0] == 1
    x = jnp.squeeze(x, axis=0)                           # (N, C, H, W)
    N, C, H, W = x.shape
    HW = H * W
    n_classes = w_cls.shape[0]
    assert w_proj.shape == (C, FEAT)
    assert w_cls.shape[1] == FEAT
    assert FEAT % N_FEAT_BLOCKS == 0

    # Native NCHW layout: free reshape only (no transpose). bf16 for the MXU.
    x_bf = x.reshape(N, C, HW).astype(jnp.bfloat16)
    w_proj_bf = w_proj.astype(jnp.bfloat16)
    w_cls_f32 = w_cls.astype(jnp.float32)                # lane-dense (n_classes, FEAT)
    b_cls_f32 = b_cls.astype(jnp.float32)

    t_hw = _pick_hw_tile(HW)
    n_hw = HW // t_hw
    n_fb = N_FEAT_BLOCKS
    t_f = FEAT // n_fb

    kernel = functools.partial(_covnet_kernel, inv_hw=1.0 / HW)

    cost = pl.CostEstimate(
        flops=2 * N * HW * C * FEAT + 2 * FEAT * n_classes,
        transcendentals=0,
        bytes_accessed=(n_fb * N * C * HW * 2        # x (bf16), re-read per feat block
                        + C * FEAT * 2               # projection weight (bf16)
                        + n_classes * FEAT * 4       # classifier weight (f32)
                        + n_classes * 4              # bias
                        + n_fb * n_classes * 4),     # partial outputs
    )

    partial_out = pl.pallas_call(
        kernel,
        out_shape=jax.ShapeDtypeStruct((n_fb, 1, n_classes), jnp.float32),
        grid_spec=pltpu.PrefetchScalarGridSpec(
            num_scalar_prefetch=0,
            grid=(n_fb, N, n_hw),
            in_specs=[
                # one (C, T_HW) tile of one slice; HW is lane-dense
                pl.BlockSpec((None, C, t_hw), lambda f, n, s: (n, 0, s)),
                # (C, T_F) projection-weight block for this feature block
                pl.BlockSpec((C, t_f), lambda f, n, s: (0, f)),
                # (n_classes, T_F) classifier-weight block (lane-dense)
                pl.BlockSpec((n_classes, t_f), lambda f, n, s: (0, 0 if t_f == FEAT else f)),
                # bias
                pl.BlockSpec((1, n_classes), lambda f, n, s: (0, 0)),
            ],
            out_specs=pl.BlockSpec((None, 1, n_classes), lambda f, n, s: (f, 0, 0)),
            scratch_shapes=[
                pltpu.VMEM((1, t_f), jnp.float32),   # per-slice spatial sum
                pltpu.VMEM((1, t_f), jnp.float32),   # running max over slices
            ],
        ),
        compiler_params=pltpu.CompilerParams(
            # N and HW are carried reductions -> keep them "arbitrary";
            # the FEAT split is embarrassingly parallel -> megacore on v7x.
            dimension_semantics=("parallel", "arbitrary", "arbitrary"),
            vmem_limit_bytes=32 * 1024 * 1024,
        ),
        cost_estimate=cost,
    )(x_bf, w_proj_bf, w_cls_f32, b_cls_f32)

    # Sum the per-feature-block partial logits (bias was added once, in block 0).
    return jnp.sum(partial_out, axis=0)                  # (1, n_classes)


def covnet_reference(x, w_proj, w_cls, b_cls):
    """Plain-JAX f32 reference for correctness checking."""
    x = jnp.squeeze(x, axis=0)                           # (N, C, H, W)
    N, C, H, W = x.shape
    x_nhwc = jnp.transpose(x, (0, 2, 3, 1)).reshape(N, H * W, C)
    feat = jnp.maximum(jnp.einsum("nsc,cf->nsf", x_nhwc, w_proj), 0.0)
    pooled = jnp.mean(feat, axis=1)                      # (N, FEAT)
    flat = jnp.max(pooled, axis=0, keepdims=True)        # (1, FEAT)
    return flat @ w_cls.T + b_cls                        # (1, n_classes)


if __name__ == "__main__":
    n_classes = 4
    N, C, H, W = 2, 4, 16, 16

    key = jax.random.PRNGKey(0)
    k_x, k_wp, k_wc, k_bc = jax.random.split(key, 4)

    x = jax.random.normal(k_x, (1, N, C, H, W), dtype=jnp.float32)
    # deterministic synthetic parameters (backbone proxy + classifier)
    w_proj = jax.random.normal(k_wp, (C, FEAT), dtype=jnp.float32) * 0.05
    w_cls = jax.random.normal(k_wc, (n_classes, FEAT), dtype=jnp.float32) * 0.02
    b_cls = jax.random.normal(k_bc, (1, n_classes), dtype=jnp.float32) * 0.1

    out = jax.block_until_ready(covnet_forward(x, w_proj, w_cls, b_cls))
    ref = covnet_reference(x, w_proj, w_cls, b_cls)

    assert out.shape == (1, n_classes), out.shape
    # bf16 matmul inputs with f32 accumulation -> relaxed tolerance vs f32 ref
    assert jnp.allclose(out, ref, atol=2e-2, rtol=2e-2), (out, ref)

    print("KERNEL_OK")
</pallas_src>

<mosaic_0001>
module attributes {stable_mosaic.version = 11 : i64} {
  func.func @_covnet_kernel(%arg0: i32, %arg1: i32, %arg2: i32, %arg3: memref<1x4x256xbf16, #tpu.memory_space<vmem>>, %arg4: memref<4x1024xbf16, #tpu.memory_space<vmem>>, %arg5: memref<4x1024xf32, #tpu.memory_space<vmem>>, %arg6: memref<1x4xf32, #tpu.memory_space<vmem>>, %arg7: memref<1x1x4xf32, #tpu.memory_space<vmem>>, %arg8: memref<1x1024xf32, #tpu.memory_space<vmem>>, %arg9: memref<1x1024xf32, #tpu.memory_space<vmem>>) attributes {dimension_semantics = [#tpu.dimension_semantics<parallel>, #tpu.dimension_semantics<arbitrary>, #tpu.dimension_semantics<arbitrary>], iteration_bounds = array<i64: 2, 2, 1>, scalar_prefetch = 0 : i64, scratch_operands = 2 : i64, tpu.core_type = #tpu.core_type<tc>, window_params = [{transform_indices = @transform_0, window_bounds = array<i64: 1, 4, 256>}, {transform_indices = @transform_1, window_bounds = array<i64: 4, 1024>}, {transform_indices = @transform_2, window_bounds = array<i64: 4, 1024>}, {pipeline_mode = #tpu.pipeline_mode<synchronous>, transform_indices = @transform_3, window_bounds = array<i64: 1, 4>}, {transform_indices = @transform_4, window_bounds = array<i64: 1, 1, 4>}]} {
    %c0_i32 = arith.constant 0 : i32
    %0 = arith.cmpi eq, %arg2, %c0_i32 : i32
    %1 = arith.extui %0 : i1 to i32
    %c0_i32_0 = arith.constant 0 : i32
    %2 = arith.cmpi ne, %1, %c0_i32_0 : i32
    scf.if %2 {
      %cst_18 = arith.constant 0.000000e+00 : f32
      %27 = vector.broadcast %cst_18 : f32 to vector<1x1024xf32>
      %c0_19 = arith.constant 0 : index
      %c0_20 = arith.constant 0 : index
      %28 = vector.load %arg8[%c0_19, %c0_20] : memref<1x1024xf32, #tpu.memory_space<vmem>>, vector<1x1024xf32>
      tpu.vector_store %arg8[%c0_19, %c0_20], %27 {strides = array<i32>} : memref<1x1024xf32, #tpu.memory_space<vmem>>, vector<1x1024xf32>,
    } else {
    }
    %c0_i32_1 = arith.constant 0 : i32
    %3 = arith.cmpi eq, %arg1, %c0_i32_1 : i32
    %c0_i32_2 = arith.constant 0 : i32
    %4 = arith.cmpi eq, %arg2, %c0_i32_2 : i32
    %5 = arith.andi %3, %4 : i1
    %6 = arith.extui %5 : i1 to i32
    %c0_i32_3 = arith.constant 0 : i32
    %7 = arith.cmpi ne, %6, %c0_i32_3 : i32
    scf.if %7 {
      %cst_18 = arith.constant 0xFF800000 : f32
      %27 = vector.broadcast %cst_18 : f32 to vector<1x1024xf32>
      %c0_19 = arith.constant 0 : index
      %c0_20 = arith.constant 0 : index
      %28 = vector.load %arg9[%c0_19, %c0_20] : memref<1x1024xf32, #tpu.memory_space<vmem>>, vector<1x1024xf32>
      tpu.vector_store %arg9[%c0_19, %c0_20], %27 {strides = array<i32>} : memref<1x1024xf32, #tpu.memory_space<vmem>>, vector<1x1024xf32>,
    } else {
    }
    %c0 = arith.constant 0 : index
    %c0_4 = arith.constant 0 : index
    %c0_5 = arith.constant 0 : index
    %8 = vector.load %arg3[%c0, %c0_4, %c0_5] : memref<1x4x256xbf16, #tpu.memory_space<vmem>>, vector<1x4x256xbf16>
    %9 = vector.shape_cast %8 : vector<1x4x256xbf16> to vector<4x256xbf16>
    %c0_6 = arith.constant 0 : index
    %c0_7 = arith.constant 0 : index
    %10 = vector.load %arg4[%c0_6, %c0_7] : memref<4x1024xbf16, #tpu.memory_space<vmem>>, vector<4x1024xbf16>
    %cst = arith.constant dense<0.000000e+00> : vector<256x1024xf32>
    %11 = tpu.matmul %9, %10, %cst {dimension_numbers = #tpu.dot_dimension_numbers<[0], [0], [1], [1], [0, 1, 1, 1], [], []>} : vector<4x256xbf16>, vector<4x1024xbf16>, vector<256x1024xf32> -> vector<256x1024xf32>
    %cst_8 = arith.constant 0.000000e+00 : f32
    %12 = vector.broadcast %cst_8 : f32 to vector<256x1024xf32>
    %13 = arith.maximumf %11, %12 : vector<256x1024xf32>
    %c0_9 = arith.constant 0 : index
    %c0_10 = arith.constant 0 : index
    %14 = vector.load %arg8[%c0_9, %c0_10] : memref<1x1024xf32, #tpu.memory_space<vmem>>, vector<1x1024xf32>
    %cst_11 = arith.constant dense<0.000000e+00> : vector<1024xf32>
    %15 = vector.multi_reduction <add>, %13, %cst_11 [0] : vector<256x1024xf32> to vector<1024xf32>
    %16 = vector.shape_cast %15 : vector<1024xf32> to vector<1x1024xf32>
    %17 = arith.addf %14, %16 : vector<1x1024xf32>
    %c0_12 = arith.constant 0 : index
    %c0_13 = arith.constant 0 : index
    %18 = vector.load %arg8[%c0_12, %c0_13] : memref<1x1024xf32, #tpu.memory_space<vmem>>, vector<1x1024xf32>
    tpu.vector_store %arg8[%c0_12, %c0_13], %17 {strides = array<i32>} : memref<1x1024xf32, #tpu.memory_space<vmem>>, vector<1x1024xf32>,
    %c0_i32_14 = arith.constant 0 : i32
    %19 = arith.cmpi eq, %arg2, %c0_i32_14 : i32
    %20 = arith.extui %19 : i1 to i32
    %c0_i32_15 = arith.constant 0 : i32
    %21 = arith.cmpi ne, %20, %c0_i32_15 : i32
    scf.if %21 {
      %c0_18 = arith.constant 0 : index
      %c0_19 = arith.constant 0 : index
      %27 = vector.load %arg8[%c0_18, %c0_19] : memref<1x1024xf32, #tpu.memory_space<vmem>>, vector<1x1024xf32>
      %cst_20 = arith.constant 3.906250e-03 : f32
      %28 = vector.broadcast %cst_20 : f32 to vector<1x1024xf32>
      %29 = arith.mulf %27, %28 : vector<1x1024xf32>
      %c0_21 = arith.constant 0 : index
      %c0_22 = arith.constant 0 : index
      %30 = vector.load %arg9[%c0_21, %c0_22] : memref<1x1024xf32, #tpu.memory_space<vmem>>, vector<1x1024xf32>
      %31 = arith.maximumf %30, %29 : vector<1x1024xf32>
      %c0_23 = arith.constant 0 : index
      %c0_24 = arith.constant 0 : index
      %32 = vector.load %arg9[%c0_23, %c0_24] : memref<1x1024xf32, #tpu.memory_space<vmem>>, vector<1x1024xf32>
      tpu.vector_store %arg9[%c0_23, %c0_24], %31 {strides = array<i32>} : memref<1x1024xf32, #tpu.memory_space<vmem>>, vector<1x1024xf32>,
    } else {
    }
    %c1_i32 = arith.constant 1 : i32
    %22 = arith.cmpi eq, %arg1, %c1_i32 : i32
    %c0_i32_16 = arith.constant 0 : i32
    %23 = arith.cmpi eq, %arg2, %c0_i32_16 : i32
    %24 = arith.andi %22, %23 : i1
    %25 = arith.extui %24 : i1 to i32
    %c0_i32_17 = arith.constant 0 : i32
    %26 = arith.cmpi ne, %25, %c0_i32_17 : i32
    scf.if %26 {
      %c0_18 = arith.constant 0 : index
      %c0_19 = arith.constant 0 : index
      %27 = vector.load %arg9[%c0_18, %c0_19] : memref<1x1024xf32, #tpu.memory_space<vmem>>, vector<1x1024xf32>
      %c0_20 = arith.constant 0 : index
      %c0_21 = arith.constant 0 : index
      %28 = vector.load %arg5[%c0_20, %c0_21] : memref<4x1024xf32, #tpu.memory_space<vmem>>, vector<4x1024xf32>
      %cst_22 = arith.constant dense<0.000000e+00> : vector<1x4xf32>
      %29 = tpu.matmul %27, %28, %cst_22 {dimension_numbers = #tpu.dot_dimension_numbers<[1], [1], [0], [0], [0, 0, 1, 0], [], []>} : vector<1x1024xf32>, vector<4x1024xf32>, vector<1x4xf32> -> vector<1x4xf32>
      %c0_i32_23 = arith.constant 0 : i32
      %30 = arith.cmpi eq, %arg0, %c0_i32_23 : i32
      %c0_24 = arith.constant 0 : index
      %c0_25 = arith.constant 0 : index
      %31 = vector.load %arg6[%c0_24, %c0_25] : memref<1x4xf32, #tpu.memory_space<vmem>>, vector<1x4xf32>
      %32 = arith.addf %29, %31 : vector<1x4xf32>
      %33 = arith.select %30, %32, %29 : vector<1x4xf32>
      %c0_26 = arith.constant 0 : index
      %c0_27 = arith.constant 0 : index
      %c0_28 = arith.constant 0 : index
      %34 = vector.load %arg7[%c0_26, %c0_27, %c0_28] : memref<1x1x4xf32, #tpu.memory_space<vmem>>, vector<1x1x4xf32>
      %35 = vector.shape_cast %34 : vector<1x1x4xf32> to vector<1x4xf32>
      %36 = vector.shape_cast %33 : vector<1x4xf32> to vector<1x1x4xf32>
      tpu.vector_store %arg7[%c0_26, %c0_27, %c0_28], %36 {strides = array<i32>} : memref<1x1x4xf32, #tpu.memory_space<vmem>>, vector<1x1x4xf32>,
    } else {
    }
    return
  }
  func.func @transform_0(%arg0: i32, %arg1: i32, %arg2: i32) -> (i32, i32, i32) {
    %c0_i32 = arith.constant 0 : i32
    %c0_i32_0 = arith.constant 0 : i32
    return %arg1, %c0_i32, %arg2 : i32, i32, i32
  }
  func.func @transform_1(%arg0: i32, %arg1: i32, %arg2: i32) -> (i32, i32) {
    %c0_i32 = arith.constant 0 : i32
    %c0_i32_0 = arith.constant 0 : i32
    return %c0_i32, %arg0 : i32, i32
  }
  func.func @transform_2(%arg0: i32, %arg1: i32, %arg2: i32) -> (i32, i32) {
    %c0_i32 = arith.constant 0 : i32
    %c0_i32_0 = arith.constant 0 : i32
    return %c0_i32, %arg0 : i32, i32
  }
  func.func @transform_3(%arg0: i32, %arg1: i32, %arg2: i32) -> (i32, i32) {
    %c0_i32 = arith.constant 0 : i32
    %c0_i32_0 = arith.constant 0 : i32
    %c0_i32_1 = arith.constant 0 : i32
    return %c0_i32, %c0_i32_0 : i32, i32
  }
  func.func @transform_4(%arg0: i32, %arg1: i32, %arg2: i32) -> (i32, i32, i32) {
    %c0_i32 = arith.constant 0 : i32
    %c0_i32_0 = arith.constant 0 : i32
    %c0_i32_1 = arith.constant 0 : i32
    return %arg0, %c0_i32, %c0_i32_0 : i32, i32, i32
  }
}

</mosaic_0001>

<bundles_post_ra>
// kernel: tpu_custom_call.1
= control target key start
LH: loop header
LB: loop body
LE: loop exit
PB: predicated region body
PF: predicated region fallthrough
CT: control target
= control target key end

     0   :  { %s3441_s0 = inlined_call_operand.hbm [shape: bf16[2,4,256], index: 0, kind: input, shape index: {}]   ;;  %s3442_s1 = inlined_call_operand.hbm [shape: bf16[4,2048], index: 1, kind: input, shape index: {}]   ;;  %s3443_s2 = inlined_call_operand.hbm [shape: f32[4,2048], index: 2, kind: input, shape index: {}]   ;;  %s3444_s3 = inlined_call_operand.vmem [shape: f32[1,4], index: 3, kind: input, shape index: {}]   ;;  %s3445_s4 = inlined_call_operand.hbm [shape: f32[2,1,4], index: 4, kind: output, shape index: {}]  }
   0x1   :  { %3463 = sst [smem:[#allocation23_spill]] %s3442_s1 }
   0x2   :  { %3464 = sst [smem:[#allocation24_spill]] %s3444_s3 }
   0x3   :  { %3465 = sst [smem:[#allocation25_spill]] %s3445_s4 }
   0x4   :  { %9 = vsyncpa [#allocation5], 0 }
   0x5   :  { %11 = vsyncpa [#allocation5 + $0x1], 0 }
   0x6   :  { %12 = vsyncpa [#allocation8], 0 }
   0x7   :  { %14 = vsyncpa [#allocation8 + $0x1], 0 }
   0x8   :  { %15 = vsyncpa [#allocation6], 0 }
   0x9   :  { %17 = vsyncpa [#allocation6 + $0x1], 0  ;;  %s2840_s15 = smov 0   ;;  %s2842_s16 = smov 0  }
   0xa   :  { %s2844_s17 = smov 0   ;;  %s2846_s18 = smov 0  }
   0xb   :  { %s2848_s19 = smov 0   ;;  %s2850_s20 = smov 0  }
   0xc   :  { %s2852_s21 = smov 0   ;;  %s2854_s22 = smov 0  }
   0xd   :  { %s2856_s23 = smov 0   ;;  %s2858_s24 = smov 0  }
   0xe   :  { %s2860_s25 = smov 0  }
   0xf LB: > { %3466 = sst [smem:[#allocation14_spill]] %s2764_s15  ;;  %s2896_s26 = sadd.s32 4294967295, %s2804_s25   ;;  %s2804_s25 = sphi %s2860_s25, %s23_s25   ;;  %s2800_s24 = sphi %s2858_s24, %s3510_s24   ;;  %s2796_s23 = sphi %s2856_s23, %s3509_s23   ;;  %s2792_s22 = sphi %s2854_s22, %s3508_s22   ;;  %s2788_s21 = sphi %s2852_s21, %s3507_s21   ;;  %s2784_s20 = sphi %s2850_s20, %s3516_s20   ;;  %s2780_s19 = sphi %s2848_s19, %s3515_s19   ;;  %s2776_s18 = sphi %s2846_s18, %s3514_s18   ;;  %s2772_s17 = sphi %s2844_s17, %s3513_s17   ;;  %s2768_s16 = sphi %s2842_s16, %s3512_s16   ;;  %s2764_s15 = sphi %s2840_s15, %s3511_s15  }
  0x10   : > { %3467 = sst [smem:[#allocation15_spill]] %s2788_s21  ;;  %s2365_s27 = sadd.s32 4294967294, %s2804_s25  }
  0x11   : > { %3468 = sst [smem:[#allocation16_spill]] %s2792_s22  ;;  %p3450_p0 = scmp.eq.s32.totalorder %s2804_s25, 0 }
  0x12   : > { %3469 = sst [smem:[#allocation17_spill]] %s2796_s23  ;;  %p3449_p1 = scmp.eq.s32.totalorder %s2896_s26, 0 }
  0x13   : > { %3470 = sst [smem:[#allocation18_spill]] %s2800_s24  ;;  %p84_p2 = scmp.ne.s32.totalorder %s2772_s17, %s2768_s16 }
  0x14   : > { %p90_p3 = scmp.ne.s32.totalorder %s2768_s16, %s2764_s15  ;;  %p161_p4 = scmp.eq.s32.totalorder %s2896_s26, 3 }
  0x15   : > { %p2909_p5 = por %p84_p2, %p3450_p0  ;;  %p167_p6 = scmp.eq.s32.totalorder %s2365_s27, 3 }
  0x16   : > { %p2915_p7 = por %p90_p3, %p3449_p1  ;;  %p2919_p8 = por %p161_p4, %p84_p2 }
  0x17   : > { %p2923_p9 = por %p167_p6, %p90_p3  ;;  %p3448_p10 = scmp.lt.s32.totalorder %s2804_s25, 4 }
  0x18   : > { %s3472_s30 = scalar_select %p2915_p7, 1, 0 }
  0x19   : > { %s3473_s5 = scalar_select %p2919_p8, 1, 0 }
  0x1a   : > { %s3475_s6 = scalar_select %p2923_p9, 1, 0 }
  0x1b   : > { %3474 = sst [smem:[#allocation19_spill]] %s3473_s5  ;;  %s211_s7 = sand.u32 1, %s2804_s25  }
  0x1c   : > { %3476 = sst [smem:[#allocation20_spill]] %s3475_s6  ;;  %s213_s8 = sand.u32 1, %s2772_s17  }
  0x1d   : > { %s2371_s9 = sshll.u32 %s213_s8, 4  ;;  %s2456_s10 = sshll.u32 %s2800_s24, 8 }
  0x1e   : > { %s3477_s1 = sld [smem:[#allocation23_spill]]  ;;  %s215_s14 = scalar_lea.vmem [#allocation7], %s2371_s9 }
  0x1f   : > { %s223_s27 = sshll.u32 %s215_s14, 4  ;;  %p2940_p11 = pnand %p3448_p10, %p2909_p5  ;;  %s2944_s27 = int_to_ptr.vmem [resolvable:$true] %s223_s27 }
  0x20   : > { %s2946_s6 = sshll.u32 %s213_s8, 5 }
  0x21   : > { %p3460_p2 = pneg %p2940_p11 }
  0x24   : > { %s2934_s13 = scalar_lea.hbm %s3477_s1, %s2456_s10  ;;  %s2949_s10 = scalar_lea.sflag [#allocation8], %s211_s7 }
  0x25   : > { %s2588_s11 = scalar_lea.hbm %s2934_s13, 256  ;;  %s2593_s12 = scalar_lea.hbm %s3477_s1, 512 }
  0x26   : > { %p2589_p13 = scmp.ne.s32.totalorder %s2934_s13, %s2588_s11  ;;  %p2594_p5 = scmp.lt.u32.totalorder %s2934_s13, %s3477_s1 }
  0x27   : > { %p2595_p6 = scmp.lt.u32.totalorder %s2593_s12, %s2588_s11  ;;  %p2597_p1 = scmp.lt.u32.totalorder %s2588_s11, %s2934_s13 }
  0x28   : > { %p2591_p3 = pnand %p3460_p2, %p2589_p13 }
  0x29   : > { %p2596_p10 = por %p2595_p6, %p2594_p5 }
  0x2a   : > { %p2592_p4 = pneg %p2591_p3 }
  0x2b   : > { %p2598_p0 = por %p2597_p1, %p2596_p10 }
  0x2d   : > { %p2599_p12 = pnand %p2598_p0, %p2592_p4 }
  0x2f   : > { %2602 = shalt.err (!%p2599_p12)
}
  0x30   : > { %s2603_s7 = scalar_lea.vmem %s2944_s27, 256  ;;  %s2806_s8 = smov [#allocation7]  }
  0x31   : > { %p2604_p13 = scmp.ne.s32.totalorder %s2944_s27, %s2603_s7  ;;  %s2608_s29 = sshll.u32 %s2806_s8, 4  ;;  %s2609_s29 = int_to_ptr.vmem [resolvable:$false] %s2608_s29 }
  0x32   : > { %s2610_s15 = scalar_lea.vmem %s2609_s29, 512  ;;  %p2611_p8 = scmp.lt.s32.totalorder %s2944_s27, %s2609_s29 }
  0x33   : > { %p2606_p3 = pnand %p2604_p13, %p3460_p2  ;;  %p2612_p5 = scmp.lt.s32.totalorder %s2610_s15, %s2603_s7 }
  0x35   : > { %p2607_p9 = pneg %p2606_p3  ;;  %p2613_p6 = por %p2612_p5, %p2611_p8 }
  0x37   : > { %p2614_p1 = pnand %p2613_p6, %p2607_p9 }
  0x39   : > { %2617 = shalt.err (!%p2614_p1)
}
  0x3a   : > { %2479 = dma.hbm_to_vmem [thread:$0]  (!%p2940_p11), %s2934_s13, 256, %s2944_s27, %s2949_s10  }
  0x3b   : > { %p247_p0 = scmp.lt.s32.totalorder %s2804_s25, 5  ;;  %p3479_p8 = scmp.ge.s32.totalorder %s2804_s25, 1 }
  0x3c   : > { %s38_s9 = sadd.s32 1, %s2796_s23  ;;  %s42_s12 = sadd.s32 1, %s2800_s24 }
  0x3d   : > { %p2980_p9 = pnand %p3479_p8, %p247_p0  ;;  %p40_p10 = scmp.ge.s32.totalorder %s38_s9, 2 }
  0x3e   : > { %s51_s14 = sadd.s32 1, %s2784_s20  ;;  %p58_p12 = scmp.ne.s32.totalorder %s2784_s20, %s2780_s19 }
  0x3f   : > { %s3480_s11 = scalar_select %p2980_p9, 1, 0 }
  0x40   : > { %p64_p4 = scmp.ne.s32.totalorder %s2780_s19, %s2776_s18  ;;  %s3518_s9 = smov (%p40_p10, %s38_s9), 0 }
  0x41   : > { %3481 = sst [smem:[#allocation21_spill]] %s3518_s9  ;;  %s3520_s12 = smov (!%p40_p10, %s42_s12), %s2800_s24 }
  0x42   : > { %s46_s13 = ssub.s32 %s2796_s23, %s3518_s9  ;;  %p3482_p13 = scmp.eq.s32.totalorder %s2804_s25, 0 }
  0x43   : > { %p44_p5 = scmp.ge.s32.totalorder %s3520_s12, 2  ;;  %p49_p6 = scmp.eq.s32.totalorder %s46_s13, 0 }
  0x44   : > { %p2998_p3 = por %p3482_p13, %p58_p12  ;;  %p3484_p1 = scmp.eq.s32.totalorder %s2896_s26, 0 }
  0x45   : > { %s190_s18 = sand.u32 1, %s2784_s20   ;;  %s3522_s12 = smov (%p44_p5, %s3520_s12), 0 }
  0x46   : > { %p3004_p0 = por %p3484_p1, %p64_p4  ;;  %3486 = sst [smem:[#allocation22_spill]] %s3522_s12 }
  0x47   : > { %s3012_s8 = scalar_select %p49_p6, %s2784_s20, %s51_s14  }
  0x48   : > { %s3485_s7 = scalar_select %p3004_p0, 1, 0 }
  0x49   : > { %s74_s29 = ssub.s32 %s2800_s24, %s3522_s12  ;;  %s2368_s15 = sshll.u32 %s190_s18, 2 }
  0x4a   : > { %p75_p8 = scmp.eq.s32.totalorder %s74_s29, 0  ;;  %s2455_s1 = sshll.u32 %s2796_s23, 6 }
  0x4b   : > { %s3487_s9 = sadd.s32 1, %s2772_s17  ;;  %s3025_s3 = scalar_lea.hbm %s3441_s0, %s2455_s1 }
  0x4c   : > { %s3020_s4 = scalar_select %p75_p8, %s2772_s17, %s3487_s9  }
  0x4d   : > { %s194_s22 = scalar_lea.vmem [#allocation4], %s2368_s15  ;;  %p3488_p10 = scmp.lt.s32.totalorder %s2804_s25, 4 }
  0x4e   : > { %s204_s21 = sshll.u32 %s194_s22, 4  ;;  %s2457_s9 = sshll.u32 %s2800_s24, 9  ;;  %s3027_s21 = int_to_ptr.vmem [resolvable:$true] %s204_s21 }
  0x4f   : > { %p3033_p12 = pnand %p3488_p10, %p2998_p3  ;;  %s3041_s29 = scalar_lea.hbm %s3443_s2, %s2457_s9 }
  0x50   : > { %s191_s13 = scalar_lea.sflag [#allocation5], %s190_s18  ;;  %s2618_s15 = scalar_lea.hbm %s3025_s3, 64 }
  0x51   : > { %p2619_p4 = scmp.ne.s32.totalorder %s3025_s3, %s2618_s15  ;;  %p2620_p13 = pneg %p3033_p12 }
  0x52   : > { %s2623_s12 = scalar_lea.hbm %s3441_s0, 128  ;;  %p2624_p6 = scmp.lt.u32.totalorder %s3025_s3, %s3441_s0 }
  0x53   : > { %p2621_p5 = pnand %p2620_p13, %p2619_p4  ;;  %p2625_p1 = scmp.lt.u32.totalorder %s2623_s12, %s2618_s15 }
  0x54   : > { %p2627_p10 = scmp.lt.u32.totalorder %s2618_s15, %s3025_s3 }
  0x55   : > { %p2622_p3 = pneg %p2621_p5  ;;  %p2626_p8 = por %p2625_p1, %p2624_p6 }
  0x57   : > { %p2628_p2 = por %p2627_p10, %p2626_p8 }
  0x59   : > { %p2629_p7 = pnand %p2628_p2, %p2622_p3 }
  0x5b   : > { %2632 = shalt.err (!%p2629_p7)
}
  0x5c   : > { %s2633_s18 = scalar_lea.vmem %s3027_s21, 64  ;;  %s2807_s9 = smov [#allocation4]  }
  0x5d   : > { %p2634_p4 = scmp.ne.s32.totalorder %s3027_s21, %s2633_s18  ;;  %s2638_s5 = sshll.u32 %s2807_s9, 4  ;;  %s2639_s5 = int_to_ptr.vmem [resolvable:$false] %s2638_s5 }
  0x5e   : > { %s2640_s23 = scalar_lea.vmem %s2639_s5, 128  ;;  %p2641_p9 = scmp.lt.s32.totalorder %s3027_s21, %s2639_s5 }
  0x5f   : > { %p2636_p5 = pnand %p2634_p4, %p2620_p13  ;;  %p2642_p6 = scmp.lt.s32.totalorder %s2640_s23, %s2633_s18 }
  0x61   : > { %p2637_p0 = pneg %p2636_p5  ;;  %p2643_p1 = por %p2642_p6, %p2641_p9 }
  0x63   : > { %p2644_p8 = pnand %p2643_p1, %p2637_p0 }
  0x65   : > { %2647 = shalt.err (!%p2644_p8)
}
  0x66   : > { %2476 = dma.hbm_to_vmem [thread:$0]  (!%p3033_p12), %s3025_s3, 64, %s3027_s21, %s191_s13  }
  0x67   : > { %s234_s24 = scalar_lea.vmem [#allocation9], %s2946_s6  ;;  %s2648_s1 = scalar_lea.hbm %s3041_s29, 512 }
  0x68   : > { %s242_s12 = sshll.u32 %s234_s24, 4  ;;  %p2649_p7 = scmp.ne.s32.totalorder %s3041_s29, %s2648_s1  ;;  %s243_s12 = int_to_ptr.vmem [resolvable:$true] %s242_s12 }
  0x69   : > { %p3490_p2 = pneg %p2940_p11  ;;  %s2653_s22 = scalar_lea.hbm %s3443_s2, 1024 }
  0x6a   : > { %p2654_p13 = scmp.lt.u32.totalorder %s3041_s29, %s3443_s2  ;;  %p2655_p3 = scmp.lt.u32.totalorder %s2653_s22, %s2648_s1 }
  0x6b   : > { %p2651_p9 = pnand %p2649_p7, %p3490_p2  ;;  %p2657_p12 = scmp.lt.u32.totalorder %s2648_s1, %s3041_s29 }
  0x6c   : > { %p2656_p10 = por %p2655_p3, %p2654_p13 }
  0x6d   : > { %p2652_p0 = pneg %p2651_p9 }
  0x6e   : > { %p2658_p4 = por %p2657_p12, %p2656_p10 }
  0x70   : > { %p2659_p5 = pnand %p2658_p4, %p2652_p0 }
  0x72   : > { %2662 = shalt.err (!%p2659_p5)
}
  0x73   : > { %s2663_s3 = scalar_lea.vmem %s243_s12, 512  ;;  %p3491_p1 = pmov %p3490_p2 }
  0x74   : > { %p2664_p6 = scmp.ne.s32.totalorder %s243_s12, %s2663_s3  ;;  %s2808_s21 = smov [#allocation9]  }
  0x75   : > { %s2668_s6 = sshll.u32 %s2808_s21, 4  ;;  %s2669_s6 = int_to_ptr.vmem [resolvable:$false] %s2668_s6 }
  0x76   : > { %p2666_p8 = pnand %p2664_p6, %p3491_p1  ;;  %s2670_s13 = scalar_lea.vmem %s2669_s6, 1024 }
  0x77   : > { %p2671_p2 = scmp.lt.s32.totalorder %s243_s12, %s2669_s6  ;;  %p2672_p9 = scmp.lt.s32.totalorder %s2670_s13, %s2663_s3 }
  0x78   : > { %p2667_p7 = pneg %p2666_p8 }
  0x79   : > { %p2673_p3 = por %p2672_p9, %p2671_p2 }
  0x7b   : > { %p2674_p13 = pnand %p2673_p3, %p2667_p7 }
  0x7d   : > { %2677 = shalt.err (!%p2674_p13)
}
  0x7e   : > { %2482 = dma.hbm_to_vmem [thread:$0]  (!%p2940_p11), %s3041_s29, 512, %s243_s12, %s2949_s10  }
  0x7f   : > { %p3492_p0 = scmp.ne.s32.totalorder %s3480_s11, 0 }
  0x80   : > { %s253_s9 = sand.u32 (!%p3492_p0), 1, %s2780_s19   ;;  %p3493_p10 = scmp.ne.s32.totalorder (!%p3492_p0), %s3485_s7, 0 }
  0x81   : > { %251 = sbr.rel (%p3492_p0) target bundleno = 1020 (0x3fc), region = 36  ;;  %s2378_s5 = sshll.u32 (!%p3492_p0), %s253_s9, 2 }
  0x82   : > { %s254_s23 = scalar_lea.sflag (!%p3492_p0), [#allocation5], %s253_s9  ;;  %s257_s24 = scalar_lea.vmem (!%p3492_p0), [#allocation4], %s2378_s5 }
  0x88   : > { %2751 = dma.done.wait (%p3493_p10), %s254_s23, 64  }
  0x89   : > { %2753 = vsyncadd (%p3493_p10), %s254_s23, 4294967232  ;;  %s262_s28 = sand.u32 1, %s2896_s26   ;;  %s3098_s1 = sand.u32 1, %s2768_s16  }
  0x8a   : > { %s2379_s10 = sshll.u32 %s3098_s1, 4  ;;  %s263_s11 = scalar_lea.sflag [#allocation8], %s262_s28 }
  0x8b   : > { %s266_s29 = scalar_lea.vmem [#allocation7], %s2379_s10  ;;  %p3494_p11 = scmp.ne.s32.totalorder %s3472_s30, 0 }
  0x8d   : > { %2755 = dma.done.wait (%p3494_p11), %s263_s11, 768  }
  0x8e   : > { %2757 = vsyncadd (%p3494_p11), %s263_s11, 4294966528  ;;  %s3495_s12 = sld [smem:[#allocation15_spill]]  ;;  %s2380_s7 = sshll.u32 %s3098_s1, 5  ;;  %v2809_v0 = vmov 0.0  }
  0x8f   : > { %317 = vst [vmem:[#allocation2] sm:$0xff] %v2809_v0  ;;  %s3107_s15 = scalar_lea.vmem [#allocation9], %s2380_s7  ;;  %s308_s26 = scalar_lea.vmem [#allocation10], %s3098_s1 }
  0x94   : > { %p318_p12 = scmp.eq.s32.totalorder %s3495_s12, 0 }
  0x95   : > { %v2810_v1 = vmov (%p318_p12), -inf  }
  0x96   : > { %322 = sbr.rel (!%p318_p12) target bundleno = 157 (0x9d), region = 56  ;;  %323 = vst [vmem:[#allocation3] sm:$0xff] (%p318_p12), %v2810_v1 }
  0x9d PF: > { %v2382_v2 = vld.sshfl [vmem:[%s257_s24] sm:$0x33 pattern:$0x76325410]  ;;  %v376_v3 = vlaneseq  ;;  %v325_v4 = vld [vmem:[%s266_s29] sm:$0xff]  ;;  %v2812_v9 = vmov 0  }
  0x9e   : > { %338 = vxpose.xlu0.c.b16.start.end [1/1] (short) %v2382_v2, 128  ;;  %v326_v5 = vld [vmem:[%s266_s29 + $0x8] sm:$0xff]  ;;  %v2811_v6 = vmov 1983009808   ;;  %512 = vmatprep.mubr.bf16.mxu0 %v2812_v9  ;;  %v372_v11 = vcombine.high %v325_v4, %v325_v4  ;;  %vm455_vm0 = vcmask 1041408   ;;  %v335_v26 = vcombine.high %v2382_v2, %v2382_v2  ;;  %s3496_s30 = sld [smem:[#allocation15_spill]] }
  0x9f   : > { %v374_v7 = vunpack.c.l.s4 %v2811_v6  ;;  %v3110_v8 = vshrl.u32 %v376_v3, 7  ;;  %705 = vmatprep.mubr.bf16.mxu1 %v2812_v9  ;;  %v389_v12 = vcombine.high %v326_v5, %v326_v5  ;;  %vm406_vm1 = vcmask 31744  }
  0xa1   : > { %v375_v10 = vunpack.c.0.s8 %v374_v7 }
  0xa3   : > { %v378_v13 = vsub.s32 %v375_v10, %v3110_v8 }
  0xa4   : > { %p1873_p4 = scmp.eq.s32.totalorder %s3496_s30, 1 }
  0xa5   : > { %v379_v14 = vrot.slane %v325_v4, %v378_v13  ;;  %v386_v15 = vrot.slane %v372_v11, %v378_v13  ;;  %v396_v16 = vrot.slane %v326_v5, %v378_v13  ;;  %v403_v17 = vrot.slane %v389_v12, %v378_v13  ;;  %s3497_s14 = sld [smem:[#allocation16_spill]] (%p1873_p4) }
  0xa6   : > { %s3498_s3 = sld [smem:[#allocation24_spill]] (%p1873_p4)  ;;  %vm2223_vm3 = vcmask (%p1873_p4), 24576  }
  0xa7   : > { %v387_v18 = vcombine.high %v379_v14, %v379_v14  ;;  %v388_v19 = vcombine.high %v386_v15, %v386_v15  ;;  %v457_v20 = vsel %vm455_vm0, %v379_v14, 0  ;;  %v463_v21 = vsel %vm455_vm0, %v386_v15, 0 }
  0xa8   : > { %v404_v22 = vcombine.high %v396_v16, %v396_v16  ;;  %v405_v23 = vcombine.high %v403_v17, %v403_v17  ;;  %v469_v24 = vsel %vm455_vm0, %v396_v16, 0  ;;  %v475_v25 = vsel %vm455_vm0, %v403_v17, 0 }
  0xa9   : > { %2383 = vmatprep.subr.msk.bf16.mxu0 %vm455_vm0, %v387_v18  ;;  %2400 = vmatprep.subr.msk.bf16.mxu1 %vm455_vm0, %v388_v19 }
  0xaa   : > { %481 = vmatpush1.bf16.msra.mxu0 %v457_v20  ;;  %674 = vmatpush1.bf16.msra.mxu1 %v463_v21 }
  0xab   : > { %2417 = vmatprep.subr.msk.bf16.mxu0 %vm455_vm0, %v404_v22  ;;  %2434 = vmatprep.subr.msk.bf16.mxu1 %vm455_vm0, %v405_v23  ;;  %p2216_p5 = scmp.eq.s32.totalorder (%p1873_p4), %s3497_s14, 0 }
  0xbb   : > { %354 = vxpose.xlu0.c.b16.start.end [1/1] (short) %v335_v26, 128 }
 0x104   : > { %v3123_v27 = vpop.trf.xlu0 }
 0x105   : > { %2384 = vmatmul.mubr.msk.bf16.vlgmr.msra.gmra.mrb[0].mxu0 %vm406_vm1, %v3123_v27  ;;  %2401 = vmatmul.mubr.msk.bf16.vlgmr.msra.gmra.mrb[0].mxu1 %vm406_vm1, %v3123_v27 }
 0x106   : > { %867 = vmatpush1.bf16.msra.mxu0 %v469_v24  ;;  %1060 = vmatpush1.bf16.msra.mxu1 %v475_v25 }
 0x107   : > { %522 = vmatprep.mubr.bf16.mxu0 %v2812_v9  ;;  %715 = vmatprep.mubr.bf16.mxu1 %v2812_v9 }
 0x108   : > { %v3131_v28 = vpop.trf.xlu0 }
 0x10c   : > { %v3139_v29 = vpop.trf.xlu0 }
 0x10d   : > { %2385 = vmatmul.mubr.msk.bf16.gmra.mrb[4].mxu0 %vm406_vm1, %v3131_v28  ;;  %2402 = vmatmul.mubr.msk.bf16.gmra.mrb[4].mxu1 %vm406_vm1, %v3131_v28 }
 0x10e   : > { %532 = vmatprep.mubr.bf16.mxu0 %v2812_v9  ;;  %725 = vmatprep.mubr.bf16.mxu1 %v2812_v9 }
 0x110   : > { %v3147_v30 = vpop.trf.xlu0 }
 0x114   : > { %v3155_v31 = vpop.trf.xlu0 }
 0x115   : > { %2386 = vmatmul.mubr.msk.bf16.gmra.mrb[8].mxu0 %vm406_vm1, %v3139_v29  ;;  %2403 = vmatmul.mubr.msk.bf16.gmra.mrb[8].mxu1 %vm406_vm1, %v3139_v29 }
 0x116   : > { %542 = vmatprep.mubr.bf16.mxu0 %v2812_v9  ;;  %735 = vmatprep.mubr.bf16.mxu1 %v2812_v9 }
 0x118   : > { %v3163_v32 = vpop.trf.xlu0 }
 0x11c   : > { %v3171_v33 = vpop.trf.xlu0 }
 0x11d   : > { %2387 = vmatmul.mubr.msk.bf16.gmra.mrb[12].mxu0 %vm406_vm1, %v3147_v30  ;;  %2404 = vmatmul.mubr.msk.bf16.gmra.mrb[12].mxu1 %vm406_vm1, %v3147_v30 }
 0x11e   : > { %552 = vmatprep.mubr.bf16.mxu0 %v2812_v9  ;;  %745 = vmatprep.mubr.bf16.mxu1 %v2812_v9 }
 0x120   : > { %v3179_v34 = vpop.trf.xlu0 }
 0x124   : > { %v3187_v35 = vpop.trf.xlu0 }
 0x125   : > { %2388 = vmatmul.mubr.msk.bf16.gmra.mrb[16].mxu0 %vm406_vm1, %v3155_v31  ;;  %2405 = vmatmul.mubr.msk.bf16.gmra.mrb[16].mxu1 %vm406_vm1, %v3155_v31 }
 0x126   : > { %562 = vmatprep.mubr.bf16.mxu0 %v2812_v9  ;;  %755 = vmatprep.mubr.bf16.mxu1 %v2812_v9 }
 0x128   : > { %v3195_v36 = vpop.trf.xlu0 }
 0x12c   : > { %v3203_v37 = vpop.trf.xlu0 }
 0x12d   : > { %2389 = vmatmul.mubr.msk.bf16.gmra.mrb[20].mxu0 %vm406_vm1, %v3163_v32  ;;  %2406 = vmatmul.mubr.msk.bf16.gmra.mrb[20].mxu1 %vm406_vm1, %v3163_v32 }
 0x12e   : > { %572 = vmatprep.mubr.bf16.mxu0 %v2812_v9  ;;  %765 = vmatprep.mubr.bf16.mxu1 %v2812_v9 }
 0x130   : > { %v3211_v38 = vpop.trf.xlu0 }
 0x134   : > { %v3219_v39 = vpop.trf.xlu0 }
 0x135   : > { %2390 = vmatmul.mubr.msk.bf16.gmra.mrb[24].mxu0 %vm406_vm1, %v3171_v33  ;;  %2407 = vmatmul.mubr.msk.bf16.gmra.mrb[24].mxu1 %vm406_vm1, %v3171_v33 }
 0x136   : > { %582 = vmatprep.mubr.bf16.mxu0 %v2812_v9  ;;  %775 = vmatprep.mubr.bf16.mxu1 %v2812_v9 }
 0x138   : > { %v3227_v40 = vpop.trf.xlu0 }
 0x13c   : > { %v3235_v41 = vpop.trf.xlu0 }
 0x13d   : > { %2391 = vmatmul.mubr.msk.bf16.gmra.mrb[28].mxu0 %vm406_vm1, %v3179_v34  ;;  %2408 = vmatmul.mubr.msk.bf16.gmra.mrb[28].mxu1 %vm406_vm1, %v3179_v34 }
 0x13e   : > { %592 = vmatprep.mubr.bf16.mxu0 %v2812_v9  ;;  %785 = vmatprep.mubr.bf16.mxu1 %v2812_v9 }
 0x140   : > { %v3243_v42 = vpop.trf.xlu0 }
 0x145   : > { %2392 = vmatmul.mubr.msk.bf16.gmra.mrb[32].mxu0 %vm406_vm1, %v3187_v35  ;;  %2409 = vmatmul.mubr.msk.bf16.gmra.mrb[32].mxu1 %vm406_vm1, %v3187_v35 }
 0x146   : > { %602 = vmatprep.mubr.bf16.mxu0 %v2812_v9  ;;  %795 = vmatprep.mubr.bf16.mxu1 %v2812_v9 }
 0x14d   : > { %2393 = vmatmul.mubr.msk.bf16.gmra.mrb[36].mxu0 %vm406_vm1, %v3195_v36  ;;  %2410 = vmatmul.mubr.msk.bf16.gmra.mrb[36].mxu1 %vm406_vm1, %v3195_v36 }
 0x14e   : > { %612 = vmatprep.mubr.bf16.mxu0 %v2812_v9  ;;  %805 = vmatprep.mubr.bf16.mxu1 %v2812_v9 }
 0x155   : > { %2394 = vmatmul.mubr.msk.bf16.gmra.mrb[40].mxu0 %vm406_vm1, %v3203_v37  ;;  %2411 = vmatmul.mubr.msk.bf16.gmra.mrb[40].mxu1 %vm406_vm1, %v3203_v37 }
 0x156   : > { %622 = vmatprep.mubr.bf16.mxu0 %v2812_v9  ;;  %815 = vmatprep.mubr.bf16.mxu1 %v2812_v9 }
 0x15d   : > { %2395 = vmatmul.mubr.msk.bf16.gmra.mrb[44].mxu0 %vm406_vm1, %v3211_v38  ;;  %2412 = vmatmul.mubr.msk.bf16.gmra.mrb[44].mxu1 %vm406_vm1, %v3211_v38 }
 0x15e   : > { %632 = vmatprep.mubr.bf16.mxu0 %v2812_v9  ;;  %825 = vmatprep.mubr.bf16.mxu1 %v2812_v9 }
 0x165   : > { %2396 = vmatmul.mubr.msk.bf16.gmra.mrb[48].mxu0 %vm406_vm1, %v3219_v39  ;;  %2413 = vmatmul.mubr.msk.bf16.gmra.mrb[48].mxu1 %vm406_vm1, %v3219_v39 }
 0x166   : > { %642 = vmatprep.mubr.bf16.mxu0 %v2812_v9  ;;  %835 = vmatprep.mubr.bf16.mxu1 %v2812_v9 }
 0x16d   : > { %2397 = vmatmul.mubr.msk.bf16.gmra.mrb[52].mxu0 %vm406_vm1, %v3227_v40  ;;  %2414 = vmatmul.mubr.msk.bf16.gmra.mrb[52].mxu1 %vm406_vm1, %v3227_v40 }
 0x16e   : > { %652 = vmatprep.mubr.bf16.mxu0 %v2812_v9  ;;  %845 = vmatprep.mubr.bf16.mxu1 %v2812_v9 }
 0x175   : > { %2398 = vmatmul.mubr.msk.bf16.gmra.mrb[56].mxu0 %vm406_vm1, %v3235_v41  ;;  %2415 = vmatmul.mubr.msk.bf16.gmra.mrb[56].mxu1 %vm406_vm1, %v3235_v41 }
 0x176   : > { %662 = vmatprep.mubr.bf16.mxu0 %v2812_v9  ;;  %855 = vmatprep.mubr.bf16.mxu1 %v2812_v9 }
 0x17d   : > { %2399 = vmatmul.mubr.msk.bf16.gmra.mrb[60].mxu0 %vm406_vm1, %v3243_v42  ;;  %2416 = vmatmul.mubr.msk.bf16.gmra.mrb[60].mxu1 %vm406_vm1, %v3243_v42 }
 0x17e   : > { %898 = vmatprep.mubr.bf16.mxu0 %v2812_v9  ;;  %1091 = vmatprep.mubr.bf16.mxu1 %v2812_v9 }
 0x185   : > { %2418 = vmatmul.mubr.msk.bf16.vlgmr.msra.gmra.mrb[64].mxu0 %vm406_vm1, %v3123_v27  ;;  %2435 = vmatmul.mubr.msk.bf16.vlgmr.msra.gmra.mrb[64].mxu1 %vm406_vm1, %v3123_v27 }
 0x186   : > { %908 = vmatprep.mubr.bf16.mxu0 %v2812_v9  ;;  %1101 = vmatprep.mubr.bf16.mxu1 %v2812_v9 }
 0x18d   : > { %2419 = vmatmul.mubr.msk.bf16.gmra.mrb[68].mxu0 %vm406_vm1, %v3131_v28  ;;  %2436 = vmatmul.mubr.msk.bf16.gmra.mrb[68].mxu1 %vm406_vm1, %v3131_v28 }
 0x18e   : > { %918 = vmatprep.mubr.bf16.mxu0 %v2812_v9  ;;  %1111 = vmatprep.mubr.bf16.mxu1 %v2812_v9 }
 0x195   : > { %2420 = vmatmul.mubr.msk.bf16.gmra.mrb[72].mxu0 %vm406_vm1, %v3139_v29  ;;  %2437 = vmatmul.mubr.msk.bf16.gmra.mrb[72].mxu1 %vm406_vm1, %v3139_v29 }
 0x196   : > { %928 = vmatprep.mubr.bf16.mxu0 %v2812_v9  ;;  %1121 = vmatprep.mubr.bf16.mxu1 %v2812_v9 }
 0x19d   : > { %2421 = vmatmul.mubr.msk.bf16.gmra.mrb[76].mxu0 %vm406_vm1, %v3147_v30  ;;  %2438 = vmatmul.mubr.msk.bf16.gmra.mrb[76].mxu1 %vm406_vm1, %v3147_v30 }
 0x19e   : > { %938 = vmatprep.mubr.bf16.mxu0 %v2812_v9  ;;  %1131 = vmatprep.mubr.bf16.mxu1 %v2812_v9 }
 0x1a5   : > { %2422 = vmatmul.mubr.msk.bf16.gmra.mrb[80].mxu0 %vm406_vm1, %v3155_v31  ;;  %2439 = vmatmul.mubr.msk.bf16.gmra.mrb[80].mxu1 %vm406_vm1, %v3155_v31 }
 0x1a6   : > { %948 = vmatprep.mubr.bf16.mxu0 %v2812_v9  ;;  %1141 = vmatprep.mubr.bf16.mxu1 %v2812_v9 }
 0x1ad   : > { %2423 = vmatmul.mubr.msk.bf16.gmra.mrb[84].mxu0 %vm406_vm1, %v3163_v32  ;;  %2440 = vmatmul.mubr.msk.bf16.gmra.mrb[84].mxu1 %vm406_vm1, %v3163_v32 }
 0x1ae   : > { %958 = vmatprep.mubr.bf16.mxu0 %v2812_v9  ;;  %1151 = vmatprep.mubr.bf16.mxu1 %v2812_v9 }
 0x1b5   : > { %2424 = vmatmul.mubr.msk.bf16.gmra.mrb[88].mxu0 %vm406_vm1, %v3171_v33  ;;  %2441 = vmatmul.mubr.msk.bf16.gmra.mrb[88].mxu1 %vm406_vm1, %v3171_v33 }
 0x1b6   : > { %968 = vmatprep.mubr.bf16.mxu0 %v2812_v9  ;;  %1161 = vmatprep.mubr.bf16.mxu1 %v2812_v9 }
 0x1bd   : > { %2425 = vmatmul.mubr.msk.bf16.gmra.mrb[92].mxu0 %vm406_vm1, %v3179_v34  ;;  %2442 = vmatmul.mubr.msk.bf16.gmra.mrb[92].mxu1 %vm406_vm1, %v3179_v34 }
 0x1be   : > { %978 = vmatprep.mubr.bf16.mxu0 %v2812_v9  ;;  %1171 = vmatprep.mubr.bf16.mxu1 %v2812_v9 }
 0x1c5   : > { %2426 = vmatmul.mubr.msk.bf16.gmra.mrb[96].mxu0 %vm406_vm1, %v3187_v35  ;;  %2443 = vmatmul.mubr.msk.bf16.gmra.mrb[96].mxu1 %vm406_vm1, %v3187_v35 }
 0x1c6   : > { %988 = vmatprep.mubr.bf16.mxu0 %v2812_v9  ;;  %1181 = vmatprep.mubr.bf16.mxu1 %v2812_v9 }
 0x1cd   : > { %2427 = vmatmul.mubr.msk.bf16.gmra.mrb[100].mxu0 %vm406_vm1, %v3195_v36  ;;  %2444 = vmatmul.mubr.msk.bf16.gmra.mrb[100].mxu1 %vm406_vm1, %v3195_v36 }
 0x1ce   : > { %998 = vmatprep.mubr.bf16.mxu0 %v2812_v9  ;;  %1191 = vmatprep.mubr.bf16.mxu1 %v2812_v9 }
 0x1d5   : > { %2428 = vmatmul.mubr.msk.bf16.gmra.mrb[104].mxu0 %vm406_vm1, %v3203_v37  ;;  %2445 = vmatmul.mubr.msk.bf16.gmra.mrb[104].mxu1 %vm406_vm1, %v3203_v37 }
 0x1d6   : > { %1008 = vmatprep.mubr.bf16.mxu0 %v2812_v9  ;;  %1201 = vmatprep.mubr.bf16.mxu1 %v2812_v9 }
 0x1d8   : > { %v514_v43 = vpop.f32.mrb[0].mxu0  ;;  %v707_v44 = vpop.f32.mrb[0].mxu1 }
 0x1d9   : > { %v516_v45 = vpop.f32.mrb[1].mxu0  ;;  %v709_v46 = vpop.f32.mrb[1].mxu1  ;;  %v1252_v49 = vmax.f32 %v514_v43, 0.0  ;;  %v1254_v50 = vmax.f32 %v707_v44, 0.0 }
 0x1da   : > { %v518_v47 = vpop.f32.mrb[2].mxu0  ;;  %v711_v48 = vpop.f32.mrb[2].mxu1  ;;  %v1253_v55 = vmax.f32 %v516_v45, 0.0  ;;  %v1255_v56 = vmax.f32 %v709_v46, 0.0 }
 0x1db   : > { %v1260_v51 = vmax.f32 %v518_v47, 0.0  ;;  %v1262_v52 = vmax.f32 %v711_v48, 0.0  ;;  %v520_v53 = vpop.f32.mrb[3].mxu0  ;;  %v713_v54 = vpop.f32.mrb[3].mxu1 }
 0x1dc   : > { %v1261_v57 = vmax.f32 %v520_v53, 0.0  ;;  %v1263_v58 = vmax.f32 %v713_v54, 0.0 }
 0x1dd   : > { %v1509_v59 = vadd.f32 %v1260_v51, %v1252_v49  ;;  %v1583_v60 = vadd.f32 %v1262_v52, %v1254_v50  ;;  %2429 = vmatmul.mubr.msk.bf16.gmra.mrb[108].mxu0 %vm406_vm1, %v3211_v38  ;;  %2446 = vmatmul.mubr.msk.bf16.gmra.mrb[108].mxu1 %vm406_vm1, %v3211_v38 }
 0x1de   : > { %v1546_v61 = vadd.f32 %v1261_v57, %v1253_v55  ;;  %v1620_v62 = vadd.f32 %v1263_v58, %v1255_v56  ;;  %1018 = vmatprep.mubr.bf16.mxu0 %v2812_v9  ;;  %1211 = vmatprep.mubr.bf16.mxu1 %v2812_v9 }
 0x1e0   : > { %v524_v63 = vpop.f32.mrb[4].mxu0  ;;  %v717_v0 = vpop.f32.mrb[4].mxu1 }
 0x1e1   : > { %v1268_v1 = vmax.f32 %v524_v63, 0.0  ;;  %v1270_v2 = vmax.f32 %v717_v0, 0.0  ;;  %v526_v3 = vpop.f32.mrb[5].mxu0  ;;  %v719_v4 = vpop.f32.mrb[5].mxu1 }
 0x1e2   : > { %v1269_v5 = vmax.f32 %v526_v3, 0.0  ;;  %v1271_v6 = vmax.f32 %v719_v4, 0.0  ;;  %v528_v7 = vpop.f32.mrb[6].mxu0  ;;  %v721_v10 = vpop.f32.mrb[6].mxu1 }
 0x1e3   : > { %v1510_v11 = vadd.f32 %v1509_v59, %v1268_v1  ;;  %v1584_v12 = vadd.f32 %v1583_v60, %v1270_v2  ;;  %v1276_v13 = vmax.f32 %v528_v7, 0.0  ;;  %v1278_v14 = vmax.f32 %v721_v10, 0.0  ;;  %v530_v15 = vpop.f32.mrb[7].mxu0  ;;  %v723_v16 = vpop.f32.mrb[7].mxu1 }
 0x1e4   : > { %v1547_v17 = vadd.f32 %v1546_v61, %v1269_v5  ;;  %v1621_v18 = vadd.f32 %v1620_v62, %v1271_v6  ;;  %v1277_v19 = vmax.f32 %v530_v15, 0.0  ;;  %v1279_v20 = vmax.f32 %v723_v16, 0.0 }
 0x1e5   : > { %v1511_v21 = vadd.f32 %v1510_v11, %v1276_v13  ;;  %v1585_v22 = vadd.f32 %v1584_v12, %v1278_v14  ;;  %2430 = vmatmul.mubr.msk.bf16.gmra.mrb[112].mxu0 %vm406_vm1, %v3219_v39  ;;  %2447 = vmatmul.mubr.msk.bf16.gmra.mrb[112].mxu1 %vm406_vm1, %v3219_v39 }
 0x1e6   : > { %v1548_v23 = vadd.f32 %v1547_v17, %v1277_v19  ;;  %v1622_v24 = vadd.f32 %v1621_v18, %v1279_v20  ;;  %1028 = vmatprep.mubr.bf16.mxu0 %v2812_v9  ;;  %1221 = vmatprep.mubr.bf16.mxu1 %v2812_v9 }
 0x1e8   : > { %v534_v25 = vpop.f32.mrb[8].mxu0  ;;  %v727_v26 = vpop.f32.mrb[8].mxu1 }
 0x1e9   : > { %v1284_v27 = vmax.f32 %v534_v25, 0.0  ;;  %v1286_v28 = vmax.f32 %v727_v26, 0.0  ;;  %v536_v29 = vpop.f32.mrb[9].mxu0  ;;  %v729_v30 = vpop.f32.mrb[9].mxu1 }
 0x1ea   : > { %v1285_v31 = vmax.f32 %v536_v29, 0.0  ;;  %v1287_v32 = vmax.f32 %v729_v30, 0.0  ;;  %v538_v33 = vpop.f32.mrb[10].mxu0  ;;  %v731_v34 = vpop.f32.mrb[10].mxu1 }
 0x1eb   : > { %v1512_v35 = vadd.f32 %v1511_v21, %v1284_v27  ;;  %v1586_v36 = vadd.f32 %v1585_v22, %v1286_v28  ;;  %v1292_v37 = vmax.f32 %v538_v33, 0.0  ;;  %v1294_v38 = vmax.f32 %v731_v34, 0.0  ;;  %v540_v39 = vpop.f32.mrb[11].mxu0  ;;  %v733_v43 = vpop.f32.mrb[11].mxu1 }
 0x1ec   : > { %v1549_v44 = vadd.f32 %v1548_v23, %v1285_v31  ;;  %v1623_v45 = vadd.f32 %v1622_v24, %v1287_v32  ;;  %v1293_v46 = vmax.f32 %v540_v39, 0.0  ;;  %v1295_v47 = vmax.f32 %v733_v43, 0.0 }
 0x1ed   : > { %v1513_v48 = vadd.f32 %v1512_v35, %v1292_v37  ;;  %v1587_v49 = vadd.f32 %v1586_v36, %v1294_v38  ;;  %2431 = vmatmul.mubr.msk.bf16.gmra.mrb[116].mxu0 %vm406_vm1, %v3227_v40  ;;  %2448 = vmatmul.mubr.msk.bf16.gmra.mrb[116].mxu1 %vm406_vm1, %v3227_v40 }
 0x1ee   : > { %v1550_v50 = vadd.f32 %v1549_v44, %v1293_v46  ;;  %v1624_v51 = vadd.f32 %v1623_v45, %v1295_v47  ;;  %1038 = vmatprep.mubr.bf16.mxu0 %v2812_v9  ;;  %1231 = vmatprep.mubr.bf16.mxu1 %v2812_v9 }
 0x1f0   : > { %v544_v52 = vpop.f32.mrb[12].mxu0  ;;  %v737_v53 = vpop.f32.mrb[12].mxu1 }
 0x1f1   : > { %v1300_v54 = vmax.f32 %v544_v52, 0.0  ;;  %v1302_v55 = vmax.f32 %v737_v53, 0.0  ;;  %v546_v56 = vpop.f32.mrb[13].mxu0  ;;  %v739_v57 = vpop.f32.mrb[13].mxu1 }
 0x1f2   : > { %v1301_v58 = vmax.f32 %v546_v56, 0.0  ;;  %v1303_v59 = vmax.f32 %v739_v57, 0.0  ;;  %v548_v60 = vpop.f32.mrb[14].mxu0  ;;  %v741_v61 = vpop.f32.mrb[14].mxu1 }
 0x1f3   : > { %v1514_v62 = vadd.f32 %v1513_v48, %v1300_v54  ;;  %v1588_v63 = vadd.f32 %v1587_v49, %v1302_v55  ;;  %v1308_v0 = vmax.f32 %v548_v60, 0.0  ;;  %v1310_v40 = vmax.f32 %v741_v61, 0.0  ;;  %v550_v1 = vpop.f32.mrb[15].mxu0  ;;  %v743_v2 = vpop.f32.mrb[15].mxu1 }
 0x1f4   : > { %v1551_v3 = vadd.f32 %v1550_v50, %v1301_v58  ;;  %v1625_v4 = vadd.f32 %v1624_v51, %v1303_v59  ;;  %v1309_v5 = vmax.f32 %v550_v1, 0.0  ;;  %v1311_v6 = vmax.f32 %v743_v2, 0.0 }
 0x1f5   : > { %v1515_v7 = vadd.f32 %v1514_v62, %v1308_v0  ;;  %v1589_v10 = vadd.f32 %v1588_v63, %v1310_v40  ;;  %2432 = vmatmul.mubr.msk.bf16.gmra.mrb[120].mxu0 %vm406_vm1, %v3235_v41  ;;  %2449 = vmatmul.mubr.msk.bf16.gmra.mrb[120].mxu1 %vm406_vm1, %v3235_v41 }
 0x1f6   : > { %v1552_v11 = vadd.f32 %v1551_v3, %v1309_v5  ;;  %v1626_v12 = vadd.f32 %v1625_v4, %v1311_v6  ;;  %1048 = vmatprep.mubr.bf16.mxu0 %v2812_v9  ;;  %1241 = vmatprep.mubr.bf16.mxu1 %v2812_v9 }
 0x1f8   : > { %v554_v13 = vpop.f32.mrb[16].mxu0  ;;  %v747_v14 = vpop.f32.mrb[16].mxu1 }
 0x1f9   : > { %v1316_v15 = vmax.f32 %v554_v13, 0.0  ;;  %v1318_v16 = vmax.f32 %v747_v14, 0.0  ;;  %v556_v17 = vpop.f32.mrb[17].mxu0  ;;  %v749_v18 = vpop.f32.mrb[17].mxu1 }
 0x1fa   : > { %v1317_v19 = vmax.f32 %v556_v17, 0.0  ;;  %v1319_v20 = vmax.f32 %v749_v18, 0.0  ;;  %v558_v21 = vpop.f32.mrb[18].mxu0  ;;  %v751_v22 = vpop.f32.mrb[18].mxu1 }
 0x1fb   : > { %v1516_v23 = vadd.f32 %v1515_v7, %v1316_v15  ;;  %v1590_v24 = vadd.f32 %v1589_v10, %v1318_v16  ;;  %v1324_v25 = vmax.f32 %v558_v21, 0.0  ;;  %v1326_v41 = vmax.f32 %v751_v22, 0.0  ;;  %v560_v26 = vpop.f32.mrb[19].mxu0  ;;  %v753_v27 = vpop.f32.mrb[19].mxu1 }
 0x1fc   : > { %v1553_v28 = vadd.f32 %v1552_v11, %v1317_v19  ;;  %v1627_v29 = vadd.f32 %v1626_v12, %v1319_v20  ;;  %v1325_v30 = vmax.f32 %v560_v26, 0.0  ;;  %v1327_v9 = vmax.f32 %v753_v27, 0.0 }
 0x1fd   : > { %v1517_v31 = vadd.f32 %v1516_v23, %v1324_v25  ;;  %v1591_v32 = vadd.f32 %v1590_v24, %v1326_v41  ;;  %2433 = vmatmul.mubr.msk.bf16.gmra.mrb[124].mxu0 %vm406_vm1, %v3243_v42  ;;  %2450 = vmatmul.mubr.msk.bf16.gmra.mrb[124].mxu1 %vm406_vm1, %v3243_v42 }
 0x1fe   : > { %v1554_v33 = vadd.f32 %v1553_v28, %v1325_v30  ;;  %v1628_v34 = vadd.f32 %v1627_v29, %v1327_v9 }
 0x200   : > { %v564_v35 = vpop.f32.mrb[20].mxu0  ;;  %v757_v36 = vpop.f32.mrb[20].mxu1 }
 0x201   : > { %v1332_v37 = vmax.f32 %v564_v35, 0.0  ;;  %v1334_v38 = vmax.f32 %v757_v36, 0.0  ;;  %v566_v39 = vpop.f32.mrb[21].mxu0  ;;  %v759_v43 = vpop.f32.mrb[21].mxu1 }
 0x202   : > { %v1333_v44 = vmax.f32 %v566_v39, 0.0  ;;  %v1335_v45 = vmax.f32 %v759_v43, 0.0  ;;  %v568_v46 = vpop.f32.mrb[22].mxu0  ;;  %v761_v47 = vpop.f32.mrb[22].mxu1 }
 0x203   : > { %v1518_v48 = vadd.f32 %v1517_v31, %v1332_v37  ;;  %v1592_v49 = vadd.f32 %v1591_v32, %v1334_v38  ;;  %v1340_v50 = vmax.f32 %v568_v46, 0.0  ;;  %v1342_v51 = vmax.f32 %v761_v47, 0.0  ;;  %v570_v52 = vpop.f32.mrb[23].mxu0  ;;  %v763_v53 = vpop.f32.mrb[23].mxu1 }
 0x204   : > { %v1555_v54 = vadd.f32 %v1554_v33, %v1333_v44  ;;  %v1629_v42 = vadd.f32 %v1628_v34, %v1335_v45  ;;  %v1341_v55 = vmax.f32 %v570_v52, 0.0  ;;  %v1343_v56 = vmax.f32 %v763_v53, 0.0 }
 0x205   : > { %v1519_v57 = vadd.f32 %v1518_v48, %v1340_v50  ;;  %v1593_v58 = vadd.f32 %v1592_v49, %v1342_v51 }
 0x206   : > { %v1556_v59 = vadd.f32 %v1555_v54, %v1341_v55  ;;  %v1630_v60 = vadd.f32 %v1629_v42, %v1343_v56 }
 0x208   : > { %v574_v61 = vpop.f32.mrb[24].mxu0  ;;  %v767_v62 = vpop.f32.mrb[24].mxu1 }
 0x209   : > { %v1348_v63 = vmax.f32 %v574_v61, 0.0  ;;  %v1350_v0 = vmax.f32 %v767_v62, 0.0  ;;  %v576_v40 = vpop.f32.mrb[25].mxu0  ;;  %v769_v1 = vpop.f32.mrb[25].mxu1 }
 0x20a   : > { %v1349_v2 = vmax.f32 %v576_v40, 0.0  ;;  %v1351_v3 = vmax.f32 %v769_v1, 0.0  ;;  %v578_v4 = vpop.f32.mrb[26].mxu0  ;;  %v771_v5 = vpop.f32.mrb[26].mxu1 }
 0x20b   : > { %v1520_v6 = vadd.f32 %v1519_v57, %v1348_v63  ;;  %v1594_v7 = vadd.f32 %v1593_v58, %v1350_v0  ;;  %v1356_v10 = vmax.f32 %v578_v4, 0.0  ;;  %v1358_v11 = vmax.f32 %v771_v5, 0.0  ;;  %v580_v12 = vpop.f32.mrb[27].mxu0  ;;  %v773_v13 = vpop.f32.mrb[27].mxu1 }
 0x20c   : > { %v1557_v14 = vadd.f32 %v1556_v59, %v1349_v2  ;;  %v1631_v15 = vadd.f32 %v1630_v60, %v1351_v3  ;;  %v1357_v16 = vmax.f32 %v580_v12, 0.0  ;;  %v1359_v17 = vmax.f32 %v773_v13, 0.0 }
 0x20d   : > { %v1521_v18 = vadd.f32 %v1520_v6, %v1356_v10  ;;  %v1595_v19 = vadd.f32 %v1594_v7, %v1358_v11 }
 0x20e   : > { %v1558_v20 = vadd.f32 %v1557_v14, %v1357_v16  ;;  %v1632_v21 = vadd.f32 %v1631_v15, %v1359_v17 }
 0x210   : > { %v584_v22 = vpop.f32.mrb[28].mxu0  ;;  %v777_v23 = vpop.f32.mrb[28].mxu1 }
 0x211   : > { %v1364_v24 = vmax.f32 %v584_v22, 0.0  ;;  %v1366_v25 = vmax.f32 %v777_v23, 0.0  ;;  %v586_v41 = vpop.f32.mrb[29].mxu0  ;;  %v779_v26 = vpop.f32.mrb[29].mxu1 }
 0x212   : > { %v1365_v27 = vmax.f32 %v586_v41, 0.0  ;;  %v1367_v28 = vmax.f32 %v779_v26, 0.0  ;;  %v588_v29 = vpop.f32.mrb[30].mxu0  ;;  %v781_v30 = vpop.f32.mrb[30].mxu1 }
 0x213   : > { %v1522_v9 = vadd.f32 %v1521_v18, %v1364_v24  ;;  %v1596_v31 = vadd.f32 %v1595_v19, %v1366_v25  ;;  %v1372_v32 = vmax.f32 %v588_v29, 0.0  ;;  %v1374_v33 = vmax.f32 %v781_v30, 0.0  ;;  %v590_v34 = vpop.f32.mrb[31].mxu0  ;;  %v783_v35 = vpop.f32.mrb[31].mxu1 }
 0x214   : > { %v1559_v36 = vadd.f32 %v1558_v20, %v1365_v27  ;;  %v1633_v37 = vadd.f32 %v1632_v21, %v1367_v28  ;;  %v1373_v38 = vmax.f32 %v590_v34, 0.0  ;;  %v1375_v39 = vmax.f32 %v783_v35, 0.0 }
 0x215   : > { %v1523_v43 = vadd.f32 %v1522_v9, %v1372_v32  ;;  %v1597_v44 = vadd.f32 %v1596_v31, %v1374_v33 }
 0x216   : > { %v1560_v45 = vadd.f32 %v1559_v36, %v1373_v38  ;;  %v1634_v46 = vadd.f32 %v1633_v37, %v1375_v39 }
 0x218   : > { %v594_v47 = vpop.f32.mrb[32].mxu0  ;;  %v787_v48 = vpop.f32.mrb[32].mxu1 }
 0x219   : > { %v1380_v49 = vmax.f32 %v594_v47, 0.0  ;;  %v1382_v50 = vmax.f32 %v787_v48, 0.0  ;;  %v596_v51 = vpop.f32.mrb[33].mxu0  ;;  %v789_v52 = vpop.f32.mrb[33].mxu1 }
 0x21a   : > { %v1381_v53 = vmax.f32 %v596_v51, 0.0  ;;  %v1383_v54 = vmax.f32 %v789_v52, 0.0  ;;  %v598_v42 = vpop.f32.mrb[34].mxu0  ;;  %v791_v55 = vpop.f32.mrb[34].mxu1 }
 0x21b   : > { %v1524_v56 = vadd.f32 %v1523_v43, %v1380_v49  ;;  %v1598_v57 = vadd.f32 %v1597_v44, %v1382_v50  ;;  %v1388_v58 = vmax.f32 %v598_v42, 0.0  ;;  %v1390_v59 = vmax.f32 %v791_v55, 0.0  ;;  %v600_v60 = vpop.f32.mrb[35].mxu0  ;;  %v793_v61 = vpop.f32.mrb[35].mxu1 }
 0x21c   : > { %v1561_v62 = vadd.f32 %v1560_v45, %v1381_v53  ;;  %v1635_v63 = vadd.f32 %v1634_v46, %v1383_v54  ;;  %v1389_v0 = vmax.f32 %v600_v60, 0.0  ;;  %v1391_v40 = vmax.f32 %v793_v61, 0.0 }
 0x21d   : > { %v1525_v1 = vadd.f32 %v1524_v56, %v1388_v58  ;;  %v1599_v2 = vadd.f32 %v1598_v57, %v1390_v59 }
 0x21e   : > { %v1562_v3 = vadd.f32 %v1561_v62, %v1389_v0  ;;  %v1636_v4 = vadd.f32 %v1635_v63, %v1391_v40 }
 0x220   : > { %v604_v5 = vpop.f32.mrb[36].mxu0  ;;  %v797_v6 = vpop.f32.mrb[36].mxu1 }
 0x221   : > { %v1396_v7 = vmax.f32 %v604_v5, 0.0  ;;  %v1398_v10 = vmax.f32 %v797_v6, 0.0  ;;  %v606_v11 = vpop.f32.mrb[37].mxu0  ;;  %v799_v12 = vpop.f32.mrb[37].mxu1 }
 0x222   : > { %v1397_v13 = vmax.f32 %v606_v11, 0.0  ;;  %v1399_v14 = vmax.f32 %v799_v12, 0.0  ;;  %v608_v15 = vpop.f32.mrb[38].mxu0  ;;  %v801_v16 = vpop.f32.mrb[38].mxu1 }
 0x223   : > { %v1526_v17 = vadd.f32 %v1525_v1, %v1396_v7  ;;  %v1600_v18 = vadd.f32 %v1599_v2, %v1398_v10  ;;  %v1404_v19 = vmax.f32 %v608_v15, 0.0  ;;  %v1406_v20 = vmax.f32 %v801_v16, 0.0  ;;  %v610_v21 = vpop.f32.mrb[39].mxu0  ;;  %v803_v22 = vpop.f32.mrb[39].mxu1 }
 0x224   : > { %v1563_v23 = vadd.f32 %v1562_v3, %v1397_v13  ;;  %v1637_v24 = vadd.f32 %v1636_v4, %v1399_v14  ;;  %v1405_v25 = vmax.f32 %v610_v21, 0.0  ;;  %v1407_v41 = vmax.f32 %v803_v22, 0.0 }
 0x225   : > { %v1527_v26 = vadd.f32 %v1526_v17, %v1404_v19  ;;  %v1601_v27 = vadd.f32 %v1600_v18, %v1406_v20 }
 0x226   : > { %v1564_v28 = vadd.f32 %v1563_v23, %v1405_v25  ;;  %v1638_v29 = vadd.f32 %v1637_v24, %v1407_v41 }
 0x228   : > { %v614_v30 = vpop.f32.mrb[40].mxu0  ;;  %v807_v9 = vpop.f32.mrb[40].mxu1 }
 0x229   : > { %v1412_v31 = vmax.f32 %v614_v30, 0.0  ;;  %v1414_v32 = vmax.f32 %v807_v9, 0.0  ;;  %v616_v33 = vpop.f32.mrb[41].mxu0  ;;  %v809_v34 = vpop.f32.mrb[41].mxu1 }
 0x22a   : > { %v1413_v35 = vmax.f32 %v616_v33, 0.0  ;;  %v1415_v36 = vmax.f32 %v809_v34, 0.0  ;;  %v618_v37 = vpop.f32.mrb[42].mxu0  ;;  %v811_v38 = vpop.f32.mrb[42].mxu1 }
 0x22b   : > { %v1528_v39 = vadd.f32 %v1527_v26, %v1412_v31  ;;  %v1602_v43 = vadd.f32 %v1601_v27, %v1414_v32  ;;  %v1420_v44 = vmax.f32 %v618_v37, 0.0  ;;  %v1422_v45 = vmax.f32 %v811_v38, 0.0  ;;  %v620_v46 = vpop.f32.mrb[43].mxu0  ;;  %v813_v47 = vpop.f32.mrb[43].mxu1 }
 0x22c   : > { %v1565_v48 = vadd.f32 %v1564_v28, %v1413_v35  ;;  %v1639_v49 = vadd.f32 %v1638_v29, %v1415_v36  ;;  %v1421_v50 = vmax.f32 %v620_v46, 0.0  ;;  %v1423_v51 = vmax.f32 %v813_v47, 0.0 }
 0x22d   : > { %v1529_v52 = vadd.f32 %v1528_v39, %v1420_v44  ;;  %v1603_v53 = vadd.f32 %v1602_v43, %v1422_v45 }
 0x22e   : > { %v1566_v54 = vadd.f32 %v1565_v48, %v1421_v50  ;;  %v1640_v42 = vadd.f32 %v1639_v49, %v1423_v51 }
 0x230   : > { %v624_v55 = vpop.f32.mrb[44].mxu0  ;;  %v817_v56 = vpop.f32.mrb[44].mxu1 }
 0x231   : > { %v1428_v57 = vmax.f32 %v624_v55, 0.0  ;;  %v1430_v58 = vmax.f32 %v817_v56, 0.0  ;;  %v626_v59 = vpop.f32.mrb[45].mxu0  ;;  %v819_v60 = vpop.f32.mrb[45].mxu1 }
 0x232   : > { %v1429_v61 = vmax.f32 %v626_v59, 0.0  ;;  %v1431_v62 = vmax.f32 %v819_v60, 0.0  ;;  %v628_v63 = vpop.f32.mrb[46].mxu0  ;;  %v821_v0 = vpop.f32.mrb[46].mxu1 }
 0x233   : > { %v1530_v40 = vadd.f32 %v1529_v52, %v1428_v57  ;;  %v1604_v1 = vadd.f32 %v1603_v53, %v1430_v58  ;;  %v1436_v2 = vmax.f32 %v628_v63, 0.0  ;;  %v1438_v3 = vmax.f32 %v821_v0, 0.0  ;;  %v630_v4 = vpop.f32.mrb[47].mxu0  ;;  %v823_v5 = vpop.f32.mrb[47].mxu1 }
 0x234   : > { %v1567_v6 = vadd.f32 %v1566_v54, %v1429_v61  ;;  %v1641_v7 = vadd.f32 %v1640_v42, %v1431_v62  ;;  %v1437_v10 = vmax.f32 %v630_v4, 0.0  ;;  %v1439_v11 = vmax.f32 %v823_v5, 0.0 }
 0x235   : > { %v1531_v12 = vadd.f32 %v1530_v40, %v1436_v2  ;;  %v1605_v13 = vadd.f32 %v1604_v1, %v1438_v3 }
 0x236   : > { %v1568_v14 = vadd.f32 %v1567_v6, %v1437_v10  ;;  %v1642_v15 = vadd.f32 %v1641_v7, %v1439_v11 }
 0x238   : > { %v634_v16 = vpop.f32.mrb[48].mxu0  ;;  %v827_v17 = vpop.f32.mrb[48].mxu1 }
 0x239   : > { %v1444_v18 = vmax.f32 %v634_v16, 0.0  ;;  %v1446_v19 = vmax.f32 %v827_v17, 0.0  ;;  %v636_v20 = vpop.f32.mrb[49].mxu0  ;;  %v829_v21 = vpop.f32.mrb[49].mxu1 }
 0x23a   : > { %v1445_v22 = vmax.f32 %v636_v20, 0.0  ;;  %v1447_v23 = vmax.f32 %v829_v21, 0.0  ;;  %v638_v24 = vpop.f32.mrb[50].mxu0  ;;  %v831_v25 = vpop.f32.mrb[50].mxu1 }
 0x23b   : > { %v1532_v41 = vadd.f32 %v1531_v12, %v1444_v18  ;;  %v1606_v26 = vadd.f32 %v1605_v13, %v1446_v19  ;;  %v1452_v27 = vmax.f32 %v638_v24, 0.0  ;;  %v1454_v28 = vmax.f32 %v831_v25, 0.0  ;;  %v640_v29 = vpop.f32.mrb[51].mxu0  ;;  %v833_v30 = vpop.f32.mrb[51].mxu1 }
 0x23c   : > { %v1569_v9 = vadd.f32 %v1568_v14, %v1445_v22  ;;  %v1643_v31 = vadd.f32 %v1642_v15, %v1447_v23  ;;  %v1453_v32 = vmax.f32 %v640_v29, 0.0  ;;  %v1455_v33 = vmax.f32 %v833_v30, 0.0 }
 0x23d   : > { %v1533_v34 = vadd.f32 %v1532_v41, %v1452_v27  ;;  %v1607_v35 = vadd.f32 %v1606_v26, %v1454_v28  ;;  %v2813_v30 = vmov 1966171168  }
 0x23e   : > { %v1570_v36 = vadd.f32 %v1569_v9, %v1453_v32  ;;  %v1644_v37 = vadd.f32 %v1643_v31, %v1455_v33  ;;  %v1818_v9 = vunpack.c.l.s4 %v2813_v30 }
 0x240   : > { %v644_v38 = vpop.f32.mrb[52].mxu0  ;;  %v837_v39 = vpop.f32.mrb[52].mxu1 }
 0x241   : > { %v1460_v43 = vmax.f32 %v644_v38, 0.0  ;;  %v1462_v44 = vmax.f32 %v837_v39, 0.0  ;;  %v646_v45 = vpop.f32.mrb[53].mxu0  ;;  %v839_v46 = vpop.f32.mrb[53].mxu1 }
 0x242   : > { %v1461_v47 = vmax.f32 %v646_v45, 0.0  ;;  %v1463_v48 = vmax.f32 %v839_v46, 0.0  ;;  %v648_v49 = vpop.f32.mrb[54].mxu0  ;;  %v841_v50 = vpop.f32.mrb[54].mxu1 }
 0x243   : > { %v1534_v51 = vadd.f32 %v1533_v34, %v1460_v43  ;;  %v1608_v52 = vadd.f32 %v1607_v35, %v1462_v44  ;;  %v1468_v53 = vmax.f32 %v648_v49, 0.0  ;;  %v1470_v54 = vmax.f32 %v841_v50, 0.0  ;;  %v650_v42 = vpop.f32.mrb[55].mxu0  ;;  %v843_v55 = vpop.f32.mrb[55].mxu1 }
 0x244   : > { %v1571_v56 = vadd.f32 %v1570_v36, %v1461_v47  ;;  %v1645_v57 = vadd.f32 %v1644_v37, %v1463_v48  ;;  %v1469_v58 = vmax.f32 %v650_v42, 0.0  ;;  %v1471_v59 = vmax.f32 %v843_v55, 0.0 }
 0x245   : > { %v1535_v60 = vadd.f32 %v1534_v51, %v1468_v53  ;;  %v1609_v61 = vadd.f32 %v1608_v52, %v1470_v54  ;;  %v1819_v54 = vunpack.c.0.s8 %v1818_v9 }
 0x246   : > { %v1572_v62 = vadd.f32 %v1571_v56, %v1469_v58  ;;  %v1646_v63 = vadd.f32 %v1645_v57, %v1471_v59 }
 0x248   : > { %v654_v0 = vpop.f32.mrb[56].mxu0  ;;  %v847_v40 = vpop.f32.mrb[56].mxu1 }
 0x249   : > { %v1476_v1 = vmax.f32 %v654_v0, 0.0  ;;  %v1478_v2 = vmax.f32 %v847_v40, 0.0  ;;  %v656_v3 = vpop.f32.mrb[57].mxu0  ;;  %v849_v4 = vpop.f32.mrb[57].mxu1 }
 0x24a   : > { %v1477_v5 = vmax.f32 %v656_v3, 0.0  ;;  %v1479_v6 = vmax.f32 %v849_v4, 0.0  ;;  %v658_v7 = vpop.f32.mrb[58].mxu0  ;;  %v851_v10 = vpop.f32.mrb[58].mxu1 }
 0x24b   : > { %v1536_v11 = vadd.f32 %v1535_v60, %v1476_v1  ;;  %v1610_v12 = vadd.f32 %v1609_v61, %v1478_v2  ;;  %v1484_v13 = vmax.f32 %v658_v7, 0.0  ;;  %v1486_v14 = vmax.f32 %v851_v10, 0.0  ;;  %v660_v15 = vpop.f32.mrb[59].mxu0  ;;  %v853_v16 = vpop.f32.mrb[59].mxu1 }
 0x24c   : > { %v1573_v17 = vadd.f32 %v1572_v62, %v1477_v5  ;;  %v1647_v18 = vadd.f32 %v1646_v63, %v1479_v6  ;;  %v1485_v19 = vmax.f32 %v660_v15, 0.0  ;;  %v1487_v20 = vmax.f32 %v853_v16, 0.0 }
 0x24d   : > { %v1537_v21 = vadd.f32 %v1536_v11, %v1484_v13  ;;  %v1611_v22 = vadd.f32 %v1610_v12, %v1486_v14 }
 0x24e   : > { %v1574_v23 = vadd.f32 %v1573_v17, %v1485_v19  ;;  %v1648_v24 = vadd.f32 %v1647_v18, %v1487_v20 }
 0x250   : > { %v664_v25 = vpop.f32.mrb[60].mxu0  ;;  %v857_v41 = vpop.f32.mrb[60].mxu1 }
 0x251   : > { %v1492_v26 = vmax.f32 %v664_v25, 0.0  ;;  %v1494_v27 = vmax.f32 %v857_v41, 0.0  ;;  %v666_v28 = vpop.f32.mrb[61].mxu0  ;;  %v859_v29 = vpop.f32.mrb[61].mxu1 }
 0x252   : > { %v1493_v31 = vmax.f32 %v666_v28, 0.0  ;;  %v1495_v32 = vmax.f32 %v859_v29, 0.0  ;;  %v668_v33 = vpop.f32.mrb[62].mxu0  ;;  %v861_v34 = vpop.f32.mrb[62].mxu1 }
 0x253   : > { %v1538_v35 = vadd.f32 %v1537_v21, %v1492_v26  ;;  %v1612_v36 = vadd.f32 %v1611_v22, %v1494_v27  ;;  %v1500_v37 = vmax.f32 %v668_v33, 0.0  ;;  %v1502_v38 = vmax.f32 %v861_v34, 0.0  ;;  %v670_v39 = vpop.f32.mrb[63].mxu0  ;;  %v863_v43 = vpop.f32.mrb[63].mxu1 }
 0x254   : > { %v1575_v44 = vadd.f32 %v1574_v23, %v1493_v31  ;;  %v1649_v45 = vadd.f32 %v1648_v24, %v1495_v32  ;;  %v1501_v46 = vmax.f32 %v670_v39, 0.0  ;;  %v1503_v47 = vmax.f32 %v863_v43, 0.0 }
 0x255   : > { %v1539_v48 = vadd.f32 %v1538_v35, %v1500_v37  ;;  %v1613_v49 = vadd.f32 %v1612_v36, %v1502_v38  ;;  %v3346_v26 = vsub.s32 %v1819_v54, %v3110_v8 }
 0x256   : > { %v1576_v50 = vadd.f32 %v1575_v44, %v1501_v46  ;;  %v1650_v51 = vadd.f32 %v1649_v45, %v1503_v47 }
 0x257   : > { %v1540_v52 = vrot.slane %v1539_v48, 4  ;;  %v1614_v53 = vrot.slane %v1613_v49, 4 }
 0x258   : > { %v1577_v42 = vrot.slane %v1576_v50, 4  ;;  %v1651_v55 = vrot.slane %v1650_v51, 4  ;;  %v900_v56 = vpop.f32.mrb[64].mxu0  ;;  %v1093_v57 = vpop.f32.mrb[64].mxu1 }
 0x259   : > { %v1541_v58 = vadd.f32 %v1540_v52, %v1539_v48  ;;  %v1615_v59 = vadd.f32 %v1614_v53, %v1613_v49  ;;  %v1256_v60 = vmax.f32 %v900_v56, 0.0  ;;  %v1258_v61 = vmax.f32 %v1093_v57, 0.0  ;;  %v902_v62 = vpop.f32.mrb[65].mxu0  ;;  %v1095_v63 = vpop.f32.mrb[65].mxu1 }
 0x25a   : > { %v1578_v0 = vadd.f32 %v1577_v42, %v1576_v50  ;;  %v1652_v40 = vadd.f32 %v1651_v55, %v1650_v51  ;;  %v1257_v1 = vmax.f32 %v902_v62, 0.0  ;;  %v1259_v2 = vmax.f32 %v1095_v63, 0.0  ;;  %v904_v3 = vpop.f32.mrb[66].mxu0  ;;  %v1097_v4 = vpop.f32.mrb[66].mxu1 }
 0x25b   : > { %v1542_v5 = vrot.slane %v1541_v58, 2  ;;  %v1616_v6 = vrot.slane %v1615_v59, 2  ;;  %v1264_v7 = vmax.f32 %v904_v3, 0.0  ;;  %v1266_v10 = vmax.f32 %v1097_v4, 0.0  ;;  %v906_v11 = vpop.f32.mrb[67].mxu0  ;;  %v1099_v12 = vpop.f32.mrb[67].mxu1 }
 0x25c   : > { %v1579_v13 = vrot.slane %v1578_v0, 2  ;;  %v1653_v14 = vrot.slane %v1652_v40, 2  ;;  %v1265_v15 = vmax.f32 %v906_v11, 0.0  ;;  %v1267_v16 = vmax.f32 %v1099_v12, 0.0 }
 0x25d   : > { %v1543_v17 = vadd.f32 %v1542_v5, %v1541_v58  ;;  %v1617_v18 = vadd.f32 %v1616_v6, %v1615_v59  ;;  %v1657_v19 = vadd.f32 %v1264_v7, %v1256_v60  ;;  %v1731_v20 = vadd.f32 %v1266_v10, %v1258_v61 }
 0x25e   : > { %v1580_v21 = vadd.f32 %v1579_v13, %v1578_v0  ;;  %v1654_v22 = vadd.f32 %v1653_v14, %v1652_v40  ;;  %v1694_v23 = vadd.f32 %v1265_v15, %v1257_v1  ;;  %v1768_v24 = vadd.f32 %v1267_v16, %v1259_v2 }
 0x25f   : > { %v1544_v25 = vrot.slane %v1543_v17, 1  ;;  %v1618_v41 = vrot.slane %v1617_v18, 1 }
 0x260   : > { %v1581_v27 = vrot.slane %v1580_v21, 1  ;;  %v1655_v28 = vrot.slane %v1654_v22, 1  ;;  %v910_v29 = vpop.f32.mrb[68].mxu0  ;;  %v1103_v30 = vpop.f32.mrb[68].mxu1 }
 0x261   : > { %v1545_v9 = vadd.f32 %v1544_v25, %v1543_v17  ;;  %v1619_v31 = vadd.f32 %v1618_v41, %v1617_v18  ;;  %v1272_v32 = vmax.f32 %v910_v29, 0.0  ;;  %v1274_v33 = vmax.f32 %v1103_v30, 0.0  ;;  %v912_v34 = vpop.f32.mrb[69].mxu0  ;;  %v1105_v35 = vpop.f32.mrb[69].mxu1 }
 0x262   : > { %v1582_v36 = vadd.f32 %v1581_v27, %v1580_v21  ;;  %v1656_v37 = vadd.f32 %v1655_v28, %v1654_v22  ;;  %v1273_v38 = vmax.f32 %v912_v34, 0.0  ;;  %v1275_v39 = vmax.f32 %v1105_v35, 0.0  ;;  %v914_v43 = vpop.f32.mrb[70].mxu0  ;;  %v1107_v44 = vpop.f32.mrb[70].mxu1 }
 0x263   : > { %v1658_v45 = vadd.f32 %v1657_v19, %v1272_v32  ;;  %v1732_v46 = vadd.f32 %v1731_v20, %v1274_v33  ;;  %v1280_v47 = vmax.f32 %v914_v43, 0.0  ;;  %v1282_v48 = vmax.f32 %v1107_v44, 0.0  ;;  %v916_v49 = vpop.f32.mrb[71].mxu0  ;;  %v1109_v50 = vpop.f32.mrb[71].mxu1 }
 0x264   : > { %v1813_v51 = vcombine.low %v1545_v9, %v1582_v36  ;;  %v1814_v52 = vcombine.low %v1619_v31, %v1656_v37  ;;  %v1695_v53 = vadd.f32 %v1694_v23, %v1273_v38  ;;  %v1769_v54 = vadd.f32 %v1768_v24, %v1275_v39 }
 0x265   : > { %v1659_v42 = vadd.f32 %v1658_v45, %v1280_v47  ;;  %v1733_v55 = vadd.f32 %v1732_v46, %v1282_v48  ;;  %v1281_v56 = vmax.f32 %v916_v49, 0.0  ;;  %v1283_v57 = vmax.f32 %v1109_v50, 0.0 }
 0x266   : > { %v1823_v58 = vrot.slane %v1813_v51, %v3346_v26  ;;  %v1830_v59 = vrot.slane %v1814_v52, %v3346_v26 }
 0x267   : > { %v1696_v60 = vadd.f32 %v1695_v53, %v1281_v56  ;;  %v1770_v61 = vadd.f32 %v1769_v54, %v1283_v57 }
 0x268   : > { %v1845_v62 = vcombine.low %v1823_v58, %v1830_v59  ;;  %v920_v63 = vpop.f32.mrb[72].mxu0  ;;  %v1113_v0 = vpop.f32.mrb[72].mxu1 }
 0x269   : > { %v1288_v40 = vmax.f32 %v920_v63, 0.0  ;;  %v1290_v1 = vmax.f32 %v1113_v0, 0.0  ;;  %v922_v2 = vpop.f32.mrb[73].mxu0  ;;  %v1115_v3 = vpop.f32.mrb[73].mxu1 }
 0x26a   : > { %v3351_v4 = vrot.slane %v1845_v62, %v3346_v26  ;;  %v1289_v5 = vmax.f32 %v922_v2, 0.0  ;;  %v1291_v6 = vmax.f32 %v1115_v3, 0.0  ;;  %v924_v7 = vpop.f32.mrb[74].mxu0  ;;  %v1117_v10 = vpop.f32.mrb[74].mxu1 }
 0x26b   : > { %v1660_v11 = vadd.f32 %v1659_v42, %v1288_v40  ;;  %v1734_v12 = vadd.f32 %v1733_v55, %v1290_v1  ;;  %v1296_v13 = vmax.f32 %v924_v7, 0.0  ;;  %v1298_v14 = vmax.f32 %v1117_v10, 0.0  ;;  %v926_v15 = vpop.f32.mrb[75].mxu0  ;;  %v1119_v16 = vpop.f32.mrb[75].mxu1 }
 0x26c   : > { %v1697_v17 = vadd.f32 %v1696_v60, %v1289_v5  ;;  %v1771_v18 = vadd.f32 %v1770_v61, %v1291_v6  ;;  %v1297_v19 = vmax.f32 %v926_v15, 0.0  ;;  %v1299_v20 = vmax.f32 %v1119_v16, 0.0 }
 0x26d   : > { %v1661_v21 = vadd.f32 %v1660_v11, %v1296_v13  ;;  %v1735_v22 = vadd.f32 %v1734_v12, %v1298_v14 }
 0x26e   : > { %v1698_v23 = vadd.f32 %v1697_v17, %v1297_v19  ;;  %v1772_v24 = vadd.f32 %v1771_v18, %v1299_v20 }
 0x270   : > { %v930_v25 = vpop.f32.mrb[76].mxu0  ;;  %v1123_v41 = vpop.f32.mrb[76].mxu1 }
 0x271   : > { %v1304_v27 = vmax.f32 %v930_v25, 0.0  ;;  %v1306_v28 = vmax.f32 %v1123_v41, 0.0  ;;  %v932_v29 = vpop.f32.mrb[77].mxu0  ;;  %v1125_v30 = vpop.f32.mrb[77].mxu1 }
 0x272   : > { %v1305_v9 = vmax.f32 %v932_v29, 0.0  ;;  %v1307_v31 = vmax.f32 %v1125_v30, 0.0  ;;  %v934_v32 = vpop.f32.mrb[78].mxu0  ;;  %v1127_v33 = vpop.f32.mrb[78].mxu1 }
 0x273   : > { %v1662_v34 = vadd.f32 %v1661_v21, %v1304_v27  ;;  %v1736_v35 = vadd.f32 %v1735_v22, %v1306_v28  ;;  %v1312_v36 = vmax.f32 %v934_v32, 0.0  ;;  %v1314_v37 = vmax.f32 %v1127_v33, 0.0  ;;  %v936_v38 = vpop.f32.mrb[79].mxu0  ;;  %v1129_v39 = vpop.f32.mrb[79].mxu1 }
 0x274   : > { %v1699_v43 = vadd.f32 %v1698_v23, %v1305_v9  ;;  %v1773_v44 = vadd.f32 %v1772_v24, %v1307_v31  ;;  %v1313_v45 = vmax.f32 %v936_v38, 0.0  ;;  %v1315_v46 = vmax.f32 %v1129_v39, 0.0 }
 0x275   : > { %v1663_v47 = vadd.f32 %v1662_v34, %v1312_v36  ;;  %v1737_v48 = vadd.f32 %v1736_v35, %v1314_v37 }
 0x276   : > { %v1700_v49 = vadd.f32 %v1699_v43, %v1313_v45  ;;  %v1774_v50 = vadd.f32 %v1773_v44, %v1315_v46 }
 0x278   : > { %v940_v51 = vpop.f32.mrb[80].mxu0  ;;  %v1133_v52 = vpop.f32.mrb[80].mxu1 }
 0x279   : > { %v1320_v53 = vmax.f32 %v940_v51, 0.0  ;;  %v1322_v54 = vmax.f32 %v1133_v52, 0.0  ;;  %v942_v42 = vpop.f32.mrb[81].mxu0  ;;  %v1135_v55 = vpop.f32.mrb[81].mxu1 }
 0x27a   : > { %v1321_v56 = vmax.f32 %v942_v42, 0.0  ;;  %v1323_v57 = vmax.f32 %v1135_v55, 0.0  ;;  %v944_v58 = vpop.f32.mrb[82].mxu0  ;;  %v1137_v59 = vpop.f32.mrb[82].mxu1 }
 0x27b   : > { %v1664_v60 = vadd.f32 %v1663_v47, %v1320_v53  ;;  %v1738_v61 = vadd.f32 %v1737_v48, %v1322_v54  ;;  %v1328_v62 = vmax.f32 %v944_v58, 0.0  ;;  %v1330_v63 = vmax.f32 %v1137_v59, 0.0  ;;  %v946_v0 = vpop.f32.mrb[83].mxu0  ;;  %v1139_v40 = vpop.f32.mrb[83].mxu1 }
 0x27c   : > { %v1701_v1 = vadd.f32 %v1700_v49, %v1321_v56  ;;  %v1775_v2 = vadd.f32 %v1774_v50, %v1323_v57  ;;  %v1329_v3 = vmax.f32 %v946_v0, 0.0  ;;  %v1331_v5 = vmax.f32 %v1139_v40, 0.0 }
 0x27d   : > { %v1665_v6 = vadd.f32 %v1664_v60, %v1328_v62  ;;  %v1739_v7 = vadd.f32 %v1738_v61, %v1330_v63 }
 0x27e   : > { %v1702_v10 = vadd.f32 %v1701_v1, %v1329_v3  ;;  %v1776_v11 = vadd.f32 %v1775_v2, %v1331_v5 }
 0x280   : > { %v950_v12 = vpop.f32.mrb[84].mxu0  ;;  %v1143_v13 = vpop.f32.mrb[84].mxu1 }
 0x281   : > { %v1336_v14 = vmax.f32 %v950_v12, 0.0  ;;  %v1338_v15 = vmax.f32 %v1143_v13, 0.0  ;;  %v952_v16 = vpop.f32.mrb[85].mxu0  ;;  %v1145_v17 = vpop.f32.mrb[85].mxu1 }
 0x282   : > { %v1337_v18 = vmax.f32 %v952_v16, 0.0  ;;  %v1339_v19 = vmax.f32 %v1145_v17, 0.0  ;;  %v954_v20 = vpop.f32.mrb[86].mxu0  ;;  %v1147_v21 = vpop.f32.mrb[86].mxu1 }
 0x283   : > { %v1666_v22 = vadd.f32 %v1665_v6, %v1336_v14  ;;  %v1740_v23 = vadd.f32 %v1739_v7, %v1338_v15  ;;  %v1344_v24 = vmax.f32 %v954_v20, 0.0  ;;  %v1346_v25 = vmax.f32 %v1147_v21, 0.0  ;;  %v956_v41 = vpop.f32.mrb[87].mxu0  ;;  %v1149_v27 = vpop.f32.mrb[87].mxu1 }
 0x284   : > { %v1703_v28 = vadd.f32 %v1702_v10, %v1337_v18  ;;  %v1777_v29 = vadd.f32 %v1776_v11, %v1339_v19  ;;  %v1345_v30 = vmax.f32 %v956_v41, 0.0  ;;  %v1347_v9 = vmax.f32 %v1149_v27, 0.0 }
 0x285   : > { %v1667_v31 = vadd.f32 %v1666_v22, %v1344_v24  ;;  %v1741_v32 = vadd.f32 %v1740_v23, %v1346_v25 }
 0x286   : > { %v1704_v33 = vadd.f32 %v1703_v28, %v1345_v30  ;;  %v1778_v34 = vadd.f32 %v1777_v29, %v1347_v9 }
 0x288   : > { %v960_v35 = vpop.f32.mrb[88].mxu0  ;;  %v1153_v36 = vpop.f32.mrb[88].mxu1 }
 0x289   : > { %v1352_v37 = vmax.f32 %v960_v35, 0.0  ;;  %v1354_v38 = vmax.f32 %v1153_v36, 0.0  ;;  %v962_v39 = vpop.f32.mrb[89].mxu0  ;;  %v1155_v43 = vpop.f32.mrb[89].mxu1 }
 0x28a   : > { %v1353_v44 = vmax.f32 %v962_v39, 0.0  ;;  %v1355_v45 = vmax.f32 %v1155_v43, 0.0  ;;  %v964_v46 = vpop.f32.mrb[90].mxu0  ;;  %v1157_v47 = vpop.f32.mrb[90].mxu1 }
 0x28b   : > { %v1668_v48 = vadd.f32 %v1667_v31, %v1352_v37  ;;  %v1742_v49 = vadd.f32 %v1741_v32, %v1354_v38  ;;  %v1360_v50 = vmax.f32 %v964_v46, 0.0  ;;  %v1362_v51 = vmax.f32 %v1157_v47, 0.0  ;;  %v966_v52 = vpop.f32.mrb[91].mxu0  ;;  %v1159_v53 = vpop.f32.mrb[91].mxu1 }
 0x28c   : > { %v1705_v54 = vadd.f32 %v1704_v33, %v1353_v44  ;;  %v1779_v42 = vadd.f32 %v1778_v34, %v1355_v45  ;;  %v1361_v55 = vmax.f32 %v966_v52, 0.0  ;;  %v1363_v56 = vmax.f32 %v1159_v53, 0.0 }
 0x28d   : > { %v1669_v57 = vadd.f32 %v1668_v48, %v1360_v50  ;;  %v1743_v58 = vadd.f32 %v1742_v49, %v1362_v51 }
 0x28e   : > { %v1706_v59 = vadd.f32 %v1705_v54, %v1361_v55  ;;  %v1780_v60 = vadd.f32 %v1779_v42, %v1363_v56 }
 0x290   : > { %v970_v61 = vpop.f32.mrb[92].mxu0  ;;  %v1163_v62 = vpop.f32.mrb[92].mxu1 }
 0x291   : > { %v1368_v63 = vmax.f32 %v970_v61, 0.0  ;;  %v1370_v0 = vmax.f32 %v1163_v62, 0.0  ;;  %v972_v40 = vpop.f32.mrb[93].mxu0  ;;  %v1165_v1 = vpop.f32.mrb[93].mxu1 }
 0x292   : > { %v1369_v2 = vmax.f32 %v972_v40, 0.0  ;;  %v1371_v3 = vmax.f32 %v1165_v1, 0.0  ;;  %v974_v5 = vpop.f32.mrb[94].mxu0  ;;  %v1167_v6 = vpop.f32.mrb[94].mxu1 }
 0x293   : > { %v1670_v7 = vadd.f32 %v1669_v57, %v1368_v63  ;;  %v1744_v10 = vadd.f32 %v1743_v58, %v1370_v0  ;;  %v1376_v11 = vmax.f32 %v974_v5, 0.0  ;;  %v1378_v12 = vmax.f32 %v1167_v6, 0.0  ;;  %v976_v13 = vpop.f32.mrb[95].mxu0  ;;  %v1169_v14 = vpop.f32.mrb[95].mxu1 }
 0x294   : > { %v1707_v15 = vadd.f32 %v1706_v59, %v1369_v2  ;;  %v1781_v16 = vadd.f32 %v1780_v60, %v1371_v3  ;;  %v1377_v17 = vmax.f32 %v976_v13, 0.0  ;;  %v1379_v18 = vmax.f32 %v1169_v14, 0.0 }
 0x295   : > { %v1671_v19 = vadd.f32 %v1670_v7, %v1376_v11  ;;  %v1745_v20 = vadd.f32 %v1744_v10, %v1378_v12 }
 0x296   : > { %v1708_v21 = vadd.f32 %v1707_v15, %v1377_v17  ;;  %v1782_v22 = vadd.f32 %v1781_v16, %v1379_v18 }
 0x298   : > { %v980_v23 = vpop.f32.mrb[96].mxu0  ;;  %v1173_v24 = vpop.f32.mrb[96].mxu1 }
 0x299   : > { %v1384_v25 = vmax.f32 %v980_v23, 0.0  ;;  %v1386_v41 = vmax.f32 %v1173_v24, 0.0  ;;  %v982_v27 = vpop.f32.mrb[97].mxu0  ;;  %v1175_v28 = vpop.f32.mrb[97].mxu1 }
 0x29a   : > { %v1385_v29 = vmax.f32 %v982_v27, 0.0  ;;  %v1387_v30 = vmax.f32 %v1175_v28, 0.0  ;;  %v984_v9 = vpop.f32.mrb[98].mxu0  ;;  %v1177_v31 = vpop.f32.mrb[98].mxu1 }
 0x29b   : > { %v1672_v32 = vadd.f32 %v1671_v19, %v1384_v25  ;;  %v1746_v33 = vadd.f32 %v1745_v20, %v1386_v41  ;;  %v1392_v34 = vmax.f32 %v984_v9, 0.0  ;;  %v1394_v35 = vmax.f32 %v1177_v31, 0.0  ;;  %v986_v36 = vpop.f32.mrb[99].mxu0  ;;  %v1179_v37 = vpop.f32.mrb[99].mxu1 }
 0x29c   : > { %v1709_v38 = vadd.f32 %v1708_v21, %v1385_v29  ;;  %v1783_v39 = vadd.f32 %v1782_v22, %v1387_v30  ;;  %v1393_v43 = vmax.f32 %v986_v36, 0.0  ;;  %v1395_v44 = vmax.f32 %v1179_v37, 0.0 }
 0x29d   : > { %v1673_v45 = vadd.f32 %v1672_v32, %v1392_v34  ;;  %v1747_v46 = vadd.f32 %v1746_v33, %v1394_v35 }
 0x29e   : > { %v1710_v47 = vadd.f32 %v1709_v38, %v1393_v43  ;;  %v1784_v48 = vadd.f32 %v1783_v39, %v1395_v44 }
 0x2a0   : > { %v990_v49 = vpop.f32.mrb[100].mxu0  ;;  %v1183_v50 = vpop.f32.mrb[100].mxu1 }
 0x2a1   : > { %v1400_v51 = vmax.f32 %v990_v49, 0.0  ;;  %v1402_v52 = vmax.f32 %v1183_v50, 0.0  ;;  %v992_v53 = vpop.f32.mrb[101].mxu0  ;;  %v1185_v54 = vpop.f32.mrb[101].mxu1 }
 0x2a2   : > { %v1401_v42 = vmax.f32 %v992_v53, 0.0  ;;  %v1403_v55 = vmax.f32 %v1185_v54, 0.0  ;;  %v994_v56 = vpop.f32.mrb[102].mxu0  ;;  %v1187_v57 = vpop.f32.mrb[102].mxu1 }
 0x2a3   : > { %v1674_v58 = vadd.f32 %v1673_v45, %v1400_v51  ;;  %v1748_v59 = vadd.f32 %v1747_v46, %v1402_v52  ;;  %v1408_v60 = vmax.f32 %v994_v56, 0.0  ;;  %v1410_v61 = vmax.f32 %v1187_v57, 0.0  ;;  %v996_v62 = vpop.f32.mrb[103].mxu0  ;;  %v1189_v63 = vpop.f32.mrb[103].mxu1 }
 0x2a4   : > { %v1711_v0 = vadd.f32 %v1710_v47, %v1401_v42  ;;  %v1785_v40 = vadd.f32 %v1784_v48, %v1403_v55  ;;  %v1409_v1 = vmax.f32 %v996_v62, 0.0  ;;  %v1411_v2 = vmax.f32 %v1189_v63, 0.0 }
 0x2a5   : > { %v1675_v3 = vadd.f32 %v1674_v58, %v1408_v60  ;;  %v1749_v5 = vadd.f32 %v1748_v59, %v1410_v61 }
 0x2a6   : > { %v1712_v6 = vadd.f32 %v1711_v0, %v1409_v1  ;;  %v1786_v7 = vadd.f32 %v1785_v40, %v1411_v2 }
 0x2a8   : > { %v1000_v10 = vpop.f32.mrb[104].mxu0  ;;  %v1193_v11 = vpop.f32.mrb[104].mxu1 }
 0x2a9   : > { %v1416_v12 = vmax.f32 %v1000_v10, 0.0  ;;  %v1418_v13 = vmax.f32 %v1193_v11, 0.0  ;;  %v1002_v14 = vpop.f32.mrb[105].mxu0  ;;  %v1195_v15 = vpop.f32.mrb[105].mxu1 }
 0x2aa   : > { %v1417_v16 = vmax.f32 %v1002_v14, 0.0  ;;  %v1419_v17 = vmax.f32 %v1195_v15, 0.0  ;;  %v1004_v18 = vpop.f32.mrb[106].mxu0  ;;  %v1197_v19 = vpop.f32.mrb[106].mxu1 }
 0x2ab   : > { %v1676_v20 = vadd.f32 %v1675_v3, %v1416_v12  ;;  %v1750_v21 = vadd.f32 %v1749_v5, %v1418_v13  ;;  %v1424_v22 = vmax.f32 %v1004_v18, 0.0  ;;  %v1426_v23 = vmax.f32 %v1197_v19, 0.0  ;;  %v1006_v24 = vpop.f32.mrb[107].mxu0  ;;  %v1199_v25 = vpop.f32.mrb[107].mxu1 }
 0x2ac   : > { %v1713_v41 = vadd.f32 %v1712_v6, %v1417_v16  ;;  %v1787_v27 = vadd.f32 %v1786_v7, %v1419_v17  ;;  %v1425_v28 = vmax.f32 %v1006_v24, 0.0  ;;  %v1427_v29 = vmax.f32 %v1199_v25, 0.0 }
 0x2ad   : > { %v1677_v30 = vadd.f32 %v1676_v20, %v1424_v22  ;;  %v1751_v9 = vadd.f32 %v1750_v21, %v1426_v23 }
 0x2ae   : > { %v1714_v31 = vadd.f32 %v1713_v41, %v1425_v28  ;;  %v1788_v32 = vadd.f32 %v1787_v27, %v1427_v29 }
 0x2b0   : > { %v1010_v33 = vpop.f32.mrb[108].mxu0  ;;  %v1203_v34 = vpop.f32.mrb[108].mxu1 }
 0x2b1   : > { %v1432_v35 = vmax.f32 %v1010_v33, 0.0  ;;  %v1434_v36 = vmax.f32 %v1203_v34, 0.0  ;;  %v1012_v37 = vpop.f32.mrb[109].mxu0  ;;  %v1205_v38 = vpop.f32.mrb[109].mxu1 }
 0x2b2   : > { %v1433_v39 = vmax.f32 %v1012_v37, 0.0  ;;  %v1435_v43 = vmax.f32 %v1205_v38, 0.0  ;;  %v1014_v44 = vpop.f32.mrb[110].mxu0  ;;  %v1207_v45 = vpop.f32.mrb[110].mxu1 }
 0x2b3   : > { %v1678_v46 = vadd.f32 %v1677_v30, %v1432_v35  ;;  %v1752_v47 = vadd.f32 %v1751_v9, %v1434_v36  ;;  %v1440_v48 = vmax.f32 %v1014_v44, 0.0  ;;  %v1442_v49 = vmax.f32 %v1207_v45, 0.0  ;;  %v1016_v50 = vpop.f32.mrb[111].mxu0  ;;  %v1209_v51 = vpop.f32.mrb[111].mxu1 }
 0x2b4   : > { %v1715_v52 = vadd.f32 %v1714_v31, %v1433_v39  ;;  %v1789_v53 = vadd.f32 %v1788_v32, %v1435_v43  ;;  %v1441_v54 = vmax.f32 %v1016_v50, 0.0  ;;  %v1443_v42 = vmax.f32 %v1209_v51, 0.0 }
 0x2b5   : > { %v1679_v55 = vadd.f32 %v1678_v46, %v1440_v48  ;;  %v1753_v56 = vadd.f32 %v1752_v47, %v1442_v49 }
 0x2b6   : > { %v1716_v57 = vadd.f32 %v1715_v52, %v1441_v54  ;;  %v1790_v58 = vadd.f32 %v1789_v53, %v1443_v42 }
 0x2b8   : > { %v1020_v59 = vpop.f32.mrb[112].mxu0  ;;  %v1213_v60 = vpop.f32.mrb[112].mxu1 }
 0x2b9   : > { %v1448_v61 = vmax.f32 %v1020_v59, 0.0  ;;  %v1450_v62 = vmax.f32 %v1213_v60, 0.0  ;;  %v1022_v63 = vpop.f32.mrb[113].mxu0  ;;  %v1215_v0 = vpop.f32.mrb[113].mxu1 }
 0x2ba   : > { %v1449_v40 = vmax.f32 %v1022_v63, 0.0  ;;  %v1451_v1 = vmax.f32 %v1215_v0, 0.0  ;;  %v1024_v2 = vpop.f32.mrb[114].mxu0  ;;  %v1217_v3 = vpop.f32.mrb[114].mxu1 }
 0x2bb   : > { %v1680_v5 = vadd.f32 %v1679_v55, %v1448_v61  ;;  %v1754_v6 = vadd.f32 %v1753_v56, %v1450_v62  ;;  %v1456_v7 = vmax.f32 %v1024_v2, 0.0  ;;  %v1458_v10 = vmax.f32 %v1217_v3, 0.0  ;;  %v1026_v11 = vpop.f32.mrb[115].mxu0  ;;  %v1219_v12 = vpop.f32.mrb[115].mxu1 }
 0x2bc   : > { %v1717_v13 = vadd.f32 %v1716_v57, %v1449_v40  ;;  %v1791_v14 = vadd.f32 %v1790_v58, %v1451_v1  ;;  %v1457_v15 = vmax.f32 %v1026_v11, 0.0  ;;  %v1459_v16 = vmax.f32 %v1219_v12, 0.0 }
 0x2bd   : > { %v1681_v17 = vadd.f32 %v1680_v5, %v1456_v7  ;;  %v1755_v18 = vadd.f32 %v1754_v6, %v1458_v10 }
 0x2be   : > { %v1718_v19 = vadd.f32 %v1717_v13, %v1457_v15  ;;  %v1792_v20 = vadd.f32 %v1791_v14, %v1459_v16 }
 0x2c0   : > { %v1030_v21 = vpop.f32.mrb[116].mxu0  ;;  %v1223_v22 = vpop.f32.mrb[116].mxu1 }
 0x2c1   : > { %v1464_v23 = vmax.f32 %v1030_v21, 0.0  ;;  %v1466_v24 = vmax.f32 %v1223_v22, 0.0  ;;  %v1032_v25 = vpop.f32.mrb[117].mxu0  ;;  %v1225_v41 = vpop.f32.mrb[117].mxu1 }
 0x2c2   : > { %v1465_v27 = vmax.f32 %v1032_v25, 0.0  ;;  %v1467_v28 = vmax.f32 %v1225_v41, 0.0  ;;  %v1034_v29 = vpop.f32.mrb[118].mxu0  ;;  %v1227_v30 = vpop.f32.mrb[118].mxu1 }
 0x2c3   : > { %v1682_v9 = vadd.f32 %v1681_v17, %v1464_v23  ;;  %v1756_v31 = vadd.f32 %v1755_v18, %v1466_v24  ;;  %v1472_v32 = vmax.f32 %v1034_v29, 0.0  ;;  %v1474_v33 = vmax.f32 %v1227_v30, 0.0  ;;  %v1036_v34 = vpop.f32.mrb[119].mxu0  ;;  %v1229_v35 = vpop.f32.mrb[119].mxu1 }
 0x2c4   : > { %v1719_v36 = vadd.f32 %v1718_v19, %v1465_v27  ;;  %v1793_v37 = vadd.f32 %v1792_v20, %v1467_v28  ;;  %v1473_v38 = vmax.f32 %v1036_v34, 0.0  ;;  %v1475_v39 = vmax.f32 %v1229_v35, 0.0 }
 0x2c5   : > { %v1683_v43 = vadd.f32 %v1682_v9, %v1472_v32  ;;  %v1757_v44 = vadd.f32 %v1756_v31, %v1474_v33 }
 0x2c6   : > { %v1720_v45 = vadd.f32 %v1719_v36, %v1473_v38  ;;  %v1794_v46 = vadd.f32 %v1793_v37, %v1475_v39 }
 0x2c8   : > { %v1040_v47 = vpop.f32.mrb[120].mxu0  ;;  %v1233_v48 = vpop.f32.mrb[120].mxu1 }
 0x2c9   : > { %v1480_v49 = vmax.f32 %v1040_v47, 0.0  ;;  %v1482_v50 = vmax.f32 %v1233_v48, 0.0  ;;  %v1042_v51 = vpop.f32.mrb[121].mxu0  ;;  %v1235_v52 = vpop.f32.mrb[121].mxu1 }
 0x2ca   : > { %v1481_v53 = vmax.f32 %v1042_v51, 0.0  ;;  %v1483_v54 = vmax.f32 %v1235_v52, 0.0  ;;  %v1044_v42 = vpop.f32.mrb[122].mxu0  ;;  %v1237_v55 = vpop.f32.mrb[122].mxu1 }
 0x2cb   : > { %v1684_v56 = vadd.f32 %v1683_v43, %v1480_v49  ;;  %v1758_v57 = vadd.f32 %v1757_v44, %v1482_v50  ;;  %v1488_v58 = vmax.f32 %v1044_v42, 0.0  ;;  %v1490_v59 = vmax.f32 %v1237_v55, 0.0  ;;  %v1046_v60 = vpop.f32.mrb[123].mxu0  ;;  %v1239_v61 = vpop.f32.mrb[123].mxu1 }
 0x2cc   : > { %v1721_v62 = vadd.f32 %v1720_v45, %v1481_v53  ;;  %v1795_v63 = vadd.f32 %v1794_v46, %v1483_v54  ;;  %v1489_v0 = vmax.f32 %v1046_v60, 0.0  ;;  %v1491_v40 = vmax.f32 %v1239_v61, 0.0 }
 0x2cd   : > { %v1685_v1 = vadd.f32 %v1684_v56, %v1488_v58  ;;  %v1759_v2 = vadd.f32 %v1758_v57, %v1490_v59 }
 0x2ce   : > { %v1722_v3 = vadd.f32 %v1721_v62, %v1489_v0  ;;  %v1796_v5 = vadd.f32 %v1795_v63, %v1491_v40  ;;  %v1508_v63 = vld [vmem:[#allocation2] sm:$0xff] }
 0x2d0   : > { %v1050_v6 = vpop.f32.mrb[124].mxu0  ;;  %v1243_v7 = vpop.f32.mrb[124].mxu1 }
 0x2d1   : > { %v1496_v10 = vmax.f32 %v1050_v6, 0.0  ;;  %v1498_v11 = vmax.f32 %v1243_v7, 0.0  ;;  %v1052_v12 = vpop.f32.mrb[125].mxu0  ;;  %v1245_v13 = vpop.f32.mrb[125].mxu1  ;;  %v1881_v6 = vld [vmem:[%s3107_s15 + $0x10] sm:$0xff] (%p1873_p4) }
 0x2d2   : > { %v1497_v14 = vmax.f32 %v1052_v12, 0.0  ;;  %v1499_v15 = vmax.f32 %v1245_v13, 0.0  ;;  %v1054_v16 = vpop.f32.mrb[126].mxu0  ;;  %v1247_v17 = vpop.f32.mrb[126].mxu1  ;;  %v1930_v12 = vcombine.high (%p1873_p4), %v1881_v6, %v1881_v6  ;;  %v1880_v13 = vld [vmem:[%s3107_s15 + $0x8] sm:$0xff] (%p1873_p4) }
 0x2d3   : > { %v1686_v18 = vadd.f32 %v1685_v1, %v1496_v10  ;;  %v1760_v19 = vadd.f32 %v1759_v2, %v1498_v11  ;;  %v1504_v20 = vmax.f32 %v1054_v16, 0.0  ;;  %v1506_v21 = vmax.f32 %v1247_v17, 0.0  ;;  %v1056_v22 = vpop.f32.mrb[127].mxu0  ;;  %v1249_v23 = vpop.f32.mrb[127].mxu1  ;;  %v1870_v1 = vld [vmem:[#allocation3] sm:$0xff] }
 0x2d4   : > { %v1723_v24 = vadd.f32 %v1722_v3, %v1497_v14  ;;  %v1797_v25 = vadd.f32 %v1796_v5, %v1499_v15  ;;  %v1505_v41 = vmax.f32 %v1056_v22, 0.0  ;;  %v1507_v27 = vmax.f32 %v1249_v23, 0.0  ;;  %v1879_v5 = vld [vmem:[%s3107_s15] sm:$0xff] (%p1873_p4)  ;;  %v1882_v15 = vld [vmem:[%s3107_s15 + $0x18] sm:$0xff] (%p1873_p4)  ;;  %2076 = vmatprep.subr.mxu0 (%p1873_p4), %v1930_v12 }
 0x2d5   : > { %v1687_v28 = vadd.f32 %v1686_v18, %v1504_v20  ;;  %v1761_v29 = vadd.f32 %v1760_v19, %v1506_v21  ;;  %v1886_v10 = vsub.s32 (%p1873_p4), 0, %v3110_v8  ;;  %v1928_v11 = vcombine.high (%p1873_p4), %v1879_v5, %v1879_v5  ;;  %2077 = vmatpush1.xpose.msra.mxu0 (%p1873_p4), %v1881_v6 }
 0x2d6   : > { %v1724_v30 = vadd.f32 %v1723_v24, %v1505_v41  ;;  %v1798_v9 = vadd.f32 %v1797_v25, %v1507_v27  ;;  %v1902_v14 = vsub.s32 (%p1873_p4), 4, %v3110_v8  ;;  %v1898_v16 = vsub.s32 (%p1873_p4), 3, %v3110_v8 }
 0x2d7   : > { %v1688_v31 = vrot.slane %v1687_v28, 4  ;;  %v1762_v32 = vrot.slane %v1761_v29, 4  ;;  %v1929_v19 = vcombine.high (%p1873_p4), %v1880_v13, %v1880_v13  ;;  %1936 = vmatprep.subr.mxu1 (%p1873_p4), %v1928_v11  ;;  %v1931_v22 = vcombine.high (%p1873_p4), %v1882_v15, %v1882_v15 }
 0x2d8   : > { %v1725_v33 = vrot.slane %v1724_v30, 4  ;;  %v1799_v34 = vrot.slane %v1798_v9, 4  ;;  %v1914_v23 = vsub.s32 (%p1873_p4), 7, %v3110_v8  ;;  %1937 = vmatpush1.xpose.msra.mxu1 (%p1873_p4), %v1879_v5  ;;  %v1894_v41 = vsub.s32 (%p1873_p4), 2, %v3110_v8 }
 0x2d9   : > { %v1689_v35 = vadd.f32 %v1688_v31, %v1687_v28  ;;  %v1763_v36 = vadd.f32 %v1762_v32, %v1761_v29  ;;  %2006 = vmatprep.subr.mxu1 (%p1873_p4), %v1929_v19  ;;  %2146 = vmatprep.subr.mxu0 (%p1873_p4), %v1931_v22  ;;  %v1910_v27 = vsub.s32 (%p1873_p4), 6, %v3110_v8  ;;  %v2217_v32 = vld [vmem:[%s3498_s3] sm:$0x1] (%p1873_p4) }
 0x2da   : > { %v1726_v37 = vadd.f32 %v1725_v33, %v1724_v30  ;;  %v1800_v38 = vadd.f32 %v1799_v34, %v1798_v9 }
 0x2db   : > { %v1690_v39 = vrot.slane %v1689_v35, 2  ;;  %v1764_v43 = vrot.slane %v1763_v36, 2 }
 0x2dc   : > { %v1727_v44 = vrot.slane %v1726_v37, 2  ;;  %v1801_v45 = vrot.slane %v1800_v38, 2 }
 0x2dd   : > { %v1691_v46 = vadd.f32 %v1690_v39, %v1689_v35  ;;  %v1765_v47 = vadd.f32 %v1764_v43, %v1763_v36 }
 0x2de   : > { %v1728_v48 = vadd.f32 %v1727_v44, %v1726_v37  ;;  %v1802_v49 = vadd.f32 %v1801_v45, %v1800_v38 }
 0x2df   : > { %v1692_v50 = vrot.slane %v1691_v46, 1  ;;  %v1766_v51 = vrot.slane %v1765_v47, 1 }
 0x2e0   : > { %v1729_v52 = vrot.slane %v1728_v48, 1  ;;  %v1803_v53 = vrot.slane %v1802_v49, 1 }
 0x2e1   : > { %v1693_v54 = vadd.f32 %v1692_v50, %v1691_v46  ;;  %v1767_v42 = vadd.f32 %v1766_v51, %v1765_v47 }
 0x2e2   : > { %v1730_v55 = vadd.f32 %v1729_v52, %v1728_v48  ;;  %v1804_v56 = vadd.f32 %v1803_v53, %v1802_v49 }
 0x2e4   : > { %v1815_v57 = vcombine.low %v1693_v54, %v1730_v55  ;;  %v1816_v58 = vcombine.low %v1767_v42, %v1804_v56 }
 0x2e6   : > { %v1837_v59 = vrot.slane %v1815_v57, %v3346_v26  ;;  %v1844_v60 = vrot.slane %v1816_v58, %v3346_v26 }
 0x2e8   : > { %v1846_v61 = vcombine.low %v1837_v59, %v1844_v60 }
 0x2ea   : > { %v1860_v62 = vrot.slane %v1846_v61, %v3346_v26  ;;  %v1890_v26 = vsub.s32 (%p1873_p4), 1, %v3110_v8 }
 0x2ec   : > { %v1861_v0 = vcombine.low %v3351_v4, %v1860_v62  ;;  %v1906_v4 = vsub.s32 (%p1873_p4), 5, %v3110_v8 }
 0x2ee   : > { %v1863_v40 = vadd.f32 %v1861_v0, %v1508_v63  ;;  %1877 = sbr.rel (!%p1873_p4) target bundleno = 993 (0x3e1), region = 64 }
 0x2f0   : > { %1864 = vst [vmem:[#allocation2] sm:$0xff] %v1863_v40  ;;  %v1869_v2 = vmul.f32 0.00390625, %v1863_v40 }
 0x2f2   : > { %v1871_v3 = vmax.f32 %v1870_v1, %v1869_v2 }
 0x2f4   : > { %1872 = vst [vmem:[#allocation3] sm:$0xff] %v1871_v3 }
 0x2f5   : > { %s2219_s22 = scalar_select %p2216_p5, 1, 0 }
 0x2f7   : > { %v2220_v30 = vstv %s2219_s22 }
 0x2f8   : > { %vm2221_vm2 = vcmp.eq.s32.totalorder %v2220_v30, 1 }
 0x2fb   : > { %v1878_v7 = vld [vmem:[#allocation3] sm:$0xff] }
 0x2fc   : > { %v1891_v17 = vrot.slane %v1878_v7, %v1890_v26  ;;  %v1907_v18 = vrot.slane %v1878_v7, %v1906_v4  ;;  %v1887_v20 = vrot.slane %v1878_v7, %v1886_v10  ;;  %v1903_v21 = vrot.slane %v1878_v7, %v1902_v14 }
 0x2fd   : > { %v1899_v24 = vrot.slane %v1878_v7, %v1898_v16  ;;  %v1915_v25 = vrot.slane %v1878_v7, %v1914_v23  ;;  %v1895_v28 = vrot.slane %v1878_v7, %v1894_v41  ;;  %v1911_v29 = vrot.slane %v1878_v7, %v1910_v27 }
 0x2fe   : > { %2000 = vmatprep.mubr.f32.mxu1 %v1891_v17  ;;  %2140 = vmatprep.mubr.f32.mxu0 %v1907_v18 }
 0x2ff   : > { %2001 = vmatmul.mubr.f32.vlgmr.msra.gmra.mrb[0].mxu1 %v1887_v20  ;;  %2141 = vmatmul.mubr.f32.vlgmr.msra.gmra.mrb[0].mxu0 %v1903_v21 }
 0x300   : > { %2007 = vmatpush1.xpose.msra.mxu1 %v1880_v13  ;;  %2147 = vmatpush1.xpose.msra.mxu0 %v1882_v15 }
 0x301   : > { %2070 = vmatprep.mubr.f32.mxu1 %v1899_v24  ;;  %2210 = vmatprep.mubr.f32.mxu0 %v1915_v25 }
 0x307   : > { %2071 = vmatmul.mubr.f32.vlgmr.msra.gmra.mrb[0].mxu1 %v1895_v28  ;;  %2211 = vmatmul.mubr.f32.vlgmr.msra.gmra.mrb[0].mxu0 %v1911_v29 }
 0x3da   : > { %v2072_v9 = vpop.f32.mrb[0].mxu1  ;;  %v2212_v31 = vpop.f32.mrb[0].mxu0 }
 0x3db   : > { %v2460_v33 = vadd.f32 %v2212_v31, %v2072_v9  ;;  %v2074_v8 = vpop.f32.mrb[1].mxu1  ;;  %v2214_v34 = vpop.f32.mrb[1].mxu0 }
 0x3dd   : > { %v2218_v35 = vadd.f32 %v2460_v33, %v2217_v32 }
 0x3df   : > { %v2222_v36 = vsel %vm2221_vm2, %v2218_v35, %v2460_v33 }
 0x3e0   : > { %2224 = vst.msk [vmem:[%s308_s26] sm:$0x1] %vm2223_vm3, %v2222_v36 }
 0x3e1 PF: > { %s3499_s21 = sld [smem:[#allocation16_spill]]  ;;  %s3500_s6 = sld [smem:[#allocation19_spill]] }
 0x3e2   : > { %s3501_s23 = sld [smem:[#allocation25_spill]]  ;;  %s2238_s10 = sshll.u32 %s308_s26, 4  ;;  %s2239_s10 = int_to_ptr.vmem [resolvable:$true] %s2238_s10 }
 0x3e3   : > { %s2226_s11 = scalar_lea.sflag [#allocation6], %s3098_s1  ;;  %s2678_s29 = scalar_lea.vmem %s2239_s10, 16 }
 0x3e4   : > { %p2679_p6 = scmp.ne.s32.totalorder %s2239_s10, %s2678_s29  ;;  %s2814_s12 = smov [#allocation10]  }
 0x3e5   : > { %s2682_s7 = sshll.u32 %s2814_s12, 4  ;;  %s2683_s7 = int_to_ptr.vmem [resolvable:$false] %s2682_s7 }
 0x3e6   : > { %s2684_s15 = scalar_lea.vmem %s2683_s7, 32  ;;  %p2685_p2 = scmp.lt.s32.totalorder %s2239_s10, %s2683_s7 }
 0x3e7   : > { %s2452_s13 = sshll.u32 %s3499_s21, 4  ;;  %p3503_p1 = scmp.ne.s32.totalorder %s3500_s6, 0 }
 0x3e8   : > { %s3502_s28 = smov %s3501_s23  ;;  %s3382_s24 = scalar_lea.hbm %s3501_s23, %s2452_s13 }
 0x3e9   : > { %p2680_p8 = pnand %p2679_p6, %p3503_p1  ;;  %p2686_p9 = scmp.lt.s32.totalorder %s2684_s15, %s2678_s29 }
 0x3eb   : > { %p2681_p7 = pneg %p2680_p8  ;;  %p2687_p3 = por %p2686_p9, %p2685_p2 }
 0x3ed   : > { %p2688_p13 = pnand %p2687_p3, %p2681_p7 }
 0x3ef   : > { %2691 = shalt.err (!%p2688_p13)
}
 0x3f0   : > { %s2692_s1 = scalar_lea.hbm %s3382_s24, 16  ;;  %s2696_s14 = scalar_lea.hbm %s3502_s28, 32 }
 0x3f1   : > { %p2693_p0 = scmp.ne.s32.totalorder %s3382_s24, %s2692_s1  ;;  %p2697_p12 = scmp.lt.u32.totalorder %s3382_s24, %s3502_s28 }
 0x3f2   : > { %p2698_p4 = scmp.lt.u32.totalorder %s2696_s14, %s2692_s1  ;;  %p2700_p6 = scmp.lt.u32.totalorder %s2692_s1, %s3382_s24 }
 0x3f3   : > { %p2694_p10 = pnand %p2693_p0, %p3503_p1 }
 0x3f4   : > { %p2699_p5 = por %p2698_p4, %p2697_p12 }
 0x3f5   : > { %p2695_p11 = pneg %p2694_p10 }
 0x3f6   : > { %p2701_p8 = por %p2700_p6, %p2699_p5 }
 0x3f8   : > { %p2702_p7 = pnand %p2701_p8, %p2695_p11 }
 0x3fa   : > { %2705 = shalt.err (!%p2702_p7)
}
 0x3fb   : > { %2471 = dma.vmem_to_hbm [thread:$0]  (%p3503_p1), %s2239_s10, 16, %s3382_s24, %s2226_s11  }
 0x3fc PF: > { %s3504_s18 = sld [smem:[#allocation14_spill]]  ;;  %s3505_s3 = sld [smem:[#allocation20_spill]] }
 0x3fd   : > { %p2488_p2 = scmp.ge.s32.totalorder %s2804_s25, 2 }
 0x402   : > { %s2250_s21 = sand.u32 1, %s3504_s18   ;;  %p3506_p9 = scmp.ne.s32.totalorder %s3505_s3, 0 }
 0x403   : > { %s2251_s13 = scalar_lea.sflag [#allocation6], %s2250_s21 }
 0x404   : > { %p2484_p3 = pnand %p2488_p2, %p3506_p9 }
 0x406   : > { %2759 = dma.done.wait (!%p2484_p3), %s2251_s13, 16  }
 0x407   : > { %2761 = vsyncadd (!%p2484_p3), %s2251_s13, 4294967280  ;;  %s23_s25 = sadd.s32 1, %s2804_s25   ;;  %s3507_s21 = sld [smem:[#allocation17_spill]] }
 0x408   : > { %p20_p13 = scmp.ge.s32.totalorder %s23_s25, 6   ;;  %s3508_s22 = sld [smem:[#allocation18_spill]] }
 0x409   : > { %s3509_s23 = sld [smem:[#allocation21_spill]]  ;;  %s3510_s24 = sld [smem:[#allocation22_spill]] }
 0x40a   : > { %s3511_s15 = smov %s2768_s16  ;;  %s3512_s16 = smov %s2772_s17 }
 0x40b   : > { %s3513_s17 = smov %s3020_s4  ;;  %s3514_s18 = smov %s2780_s19 }
 0x40c   : > { %s3515_s19 = smov %s2784_s20  ;;  %s3516_s20 = smov %s3012_s8 }
 0x40d   :  { %22 = sbr.rel (!%p20_p13) target bundleno = 15 (0xf), region = 121 }
 0x414   :  { %2255 = vsyncpa [#allocation5], 1 }
 0x415   :  { %2257 = vsyncpa [#allocation5 + $0x1], 1 }
 0x416   :  { %2258 = vsyncpa [#allocation8], 1 }
 0x417   :  { %2260 = vsyncpa [#allocation8 + $0x1], 1 }
 0x418   :  { %2261 = vsyncpa [#allocation6], 1 }
 0x419   :  { %2263 = vsyncpa [#allocation6 + $0x1], 1 }

</bundles_post_ra>
